<compile_context>
chip_gen: v6e
topology: v6e:2x2x1
jax: 0.10.0
libtpu: 0.0.40
codegen_flags: <defaults>
</compile_context>

<pallas_src>
import math
from functools import partial

import jax
import jax.numpy as jnp
from jax.experimental import pallas as pl
from jax.experimental.pallas import tpu as pltpu

# ---------------- DenseTransformer.__init__ hyper-parameters -----------------
IN_CHANNELS = 8
CHANNELS = 32                          # GroupNorm(16, C) -> C must be multiple of 16
RESOLUTION = 1.0
GRID_EXTENTS = (-4.0, 1.0, 4.0, 9.0)   # (x1, z1, x2, z2)
YMIN, YMAX = -1.0, 1.0
FOCAL_LENGTH = 4.0
GN_GROUPS = 16
GN_EPS = 1e-5

ZMIN, ZMAX = GRID_EXTENTS[1], GRID_EXTENTS[3]
IN_HEIGHT = math.ceil(FOCAL_LENGTH * (YMAX - YMIN) / ZMIN)        # 8
YMID = (YMIN + YMAX) / 2.0
OUT_DEPTH = math.ceil((ZMAX - ZMIN) / RESOLUTION)                 # 8

# _make_grid(resolution, extents): meshgrid over (z, x) with 'ij' indexing, stacked [x, z]
_z = jnp.arange(GRID_EXTENTS[1], GRID_EXTENTS[3], RESOLUTION, dtype=jnp.float32)
_x = jnp.arange(GRID_EXTENTS[0], GRID_EXTENTS[2], RESOLUTION, dtype=jnp.float32)
_ZZ, _XX = jnp.meshgrid(_z, _x, indexing="ij")
BEV_GRID = jnp.stack([_XX, _ZZ], axis=-1)                         # (Z, X, 2)
Z_OUT, X_OUT = BEV_GRID.shape[0], BEV_GRID.shape[1]


# ------------------------------- Fused Pallas kernel -------------------------------
def _dense_transformer_kernel(xr_ref, wexp_ref, cbias_ref, gamma_ref, beta_ref,
                              pgn_ref, fcy_ref, fcyb_ref, wx_ref, zmask_ref,
                              csum_ref, o_ref, *, inv_count):
    # 1x1 conv, expanded over the crop-row axis:  h[w, c*Hc + hh]   -> (W, C*Hc) = (16, 256)
    h = jnp.dot(xr_ref[...], wexp_ref[...],
                preferred_element_type=jnp.float32) + cbias_ref[...]

    # GroupNorm(16, C): per-column sums (sublane reduce) -> per-group sums via one
    # block-diagonal matmul per statistic (replaces the chained s @ M @ M^T pairs).
    s1 = jnp.sum(h, axis=0, keepdims=True)                         # (1, C*Hc)
    s2 = jnp.sum(h * h, axis=0, keepdims=True)
    mean = jnp.dot(s1, pgn_ref[...], preferred_element_type=jnp.float32) * inv_count
    ex2 = jnp.dot(s2, pgn_ref[...], preferred_element_type=jnp.float32) * inv_count
    inv = jax.lax.rsqrt(ex2 - mean * mean + GN_EPS)
    flat_t = jnp.maximum((h - mean) * inv * gamma_ref[...] + beta_ref[...], 0.0)

    # fc (Conv1d k=1) fused with the static depth-axis grid_sample weights:
    #   V[w, c*Z + z] = sum_d Wy[z, d] * bev[c, d, w]
    v = jnp.dot(flat_t, fcy_ref[...],
                preferred_element_type=jnp.float32) + fcyb_ref[...]        # (W, C*Z)

    # width-axis interpolation, then select the matching z block and sum channel blocks:
    #   rb[z'X+x, c*Z+z] -> out[z'X+x, c] = rb[z'X+x, c*Z+z']
    rb = jnp.dot(wx_ref[...], v, preferred_element_type=jnp.float32)       # (Z*X, C*Z)
    o_ref[...] = jnp.dot(rb * zmask_ref[...], csum_ref[...],
                         preferred_element_type=jnp.float32)               # (Z*X, C)


# ---------------------------------- Glue (plain JAX) ---------------------------------
def _crop_to_rows(features, calib):
    """Crop each feature map to IN_HEIGHT rows around the horizon (zero padded, as
    F.pad with negative padding) and emit it as (B, W, Cin*Hc) so the fused kernel
    consumes it directly with no separate HBM transpose."""
    B, Cin, H, W = features.shape

    def crop_one(fmap, cal):
        fy = cal[1, 1]
        cy = cal[1, 2]
        vmid = YMID * fy / ZMIN + cy
        vmin = jnp.floor(vmid - IN_HEIGHT / 2.0).astype(jnp.int32)
        rows = jnp.arange(IN_HEIGHT, dtype=jnp.int32) + vmin
        valid = (rows >= 0) & (rows < H)
        gathered = fmap[:, jnp.clip(rows, 0, H - 1), :]            # (Cin, Hc, W)
        gathered = gathered * valid[None, :, None].astype(fmap.dtype)
        return gathered.reshape(Cin * IN_HEIGHT, W).T              # (W, Cin*Hc)

    return jax.vmap(crop_one)(features, calib)


def _width_interp_matrix(calib, W_in):
    """Per-batch bilinear weights of F.grid_sample along the image-width (u) axis:
    Wx[b, z*X + x, w].  (Depth-axis weights are calib independent and folded into the
    fc weight at parameter-prep time.)"""
    cal2 = calib[:, jnp.array([0, 2])][:, :, jnp.array([0, 2])]    # (B, 2, 2)
    cam = jnp.einsum("bij,zxj->bzxi", cal2, BEV_GRID)              # (B, Z, X, 2)
    u = cam[..., 0] / cam[..., 1]
    u = jnp.clip(u / W_in * 2.0 - 1.0, -1.1, 1.1)
    ix = ((u + 1.0) * W_in - 1.0) / 2.0                            # align_corners=False
    x0 = jnp.floor(ix)
    wx1 = ix - x0
    x0i = x0.astype(jnp.int32)
    # one_hot of out-of-range indices is all-zero -> implements zero padding
    Wx = ((1.0 - wx1)[..., None] * jax.nn.one_hot(x0i, W_in, dtype=jnp.float32)
          + wx1[..., None] * jax.nn.one_hot(x0i + 1, W_in, dtype=jnp.float32))
    return Wx.reshape(calib.shape[0], Z_OUT * X_OUT, W_in)         # (B, Z*X, W)


def _depth_interp_matrix():
    """Static bilinear weights along the bev-depth axis: Wy[z, d].
    Relies on calib[2] == [0, 0, 1], so the grid_sample z-coordinate == BEV z value."""
    zc = jnp.clip((_z - ZMIN) / (ZMAX - ZMIN) * 2.0 - 1.0, -1.1, 1.1)
    iy = ((zc + 1.0) * OUT_DEPTH - 1.0) / 2.0                      # align_corners=False
    y0 = jnp.floor(iy)
    wy1 = iy - y0
    y0i = y0.astype(jnp.int32)
    return ((1.0 - wy1)[:, None] * jax.nn.one_hot(y0i, OUT_DEPTH, dtype=jnp.float32)
            + wy1[:, None] * jax.nn.one_hot(y0i + 1, OUT_DEPTH, dtype=jnp.float32))


# ------------------------------ Parameter prep (hoisted) ------------------------------
def prepare_params(params):
    """Build all calib-independent kernel operands once, outside the hot path."""
    Hc, D, C, Z, X = IN_HEIGHT, OUT_DEPTH, CHANNELS, Z_OUT, X_OUT
    Cin = IN_CHANNELS
    cpg = C // GN_GROUPS
    # conv expanded over rows: wexp[ci*Hc+hh, c*Hc+hh'] = conv_w[ci, c] * (hh == hh')
    wexp = jnp.kron(params["conv_w"], jnp.eye(Hc, dtype=jnp.float32))      # (Cin*Hc, C*Hc)
    cbias = jnp.repeat(params["conv_b"], Hc)[None, :]                      # (1, C*Hc)
    gamma = jnp.repeat(params["gn_gamma"], Hc)[None, :]
    beta = jnp.repeat(params["gn_beta"], Hc)[None, :]
    # block-diagonal "sum over my group" matrix on the fused (channel, row) axis
    grp = jnp.arange(C * Hc) // (cpg * Hc)
    pgn = (grp[:, None] == grp[None, :]).astype(jnp.float32)               # (C*Hc, C*Hc)
    # fc fused with the static depth-axis interpolation:
    #   fcy[i, c*Z+z] = sum_d fc_w[c*D+d, i] * Wy[z, d]
    wy = _depth_interp_matrix()                                            # (Z, D)
    fcy = jnp.einsum("cdi,zd->icz", params["fc_w"].reshape(C, D, Cin * 0 + C * Hc), wy)
    fcy = fcy.reshape(C * Hc, C * Z)                                       # (C*Hc, C*Z)
    fcyb = jnp.einsum("cd,zd->cz", params["fc_b"].reshape(C, D), wy).reshape(1, C * Z)
    # z-block selection + channel-block summation used by the final resample matmul
    zmask = ((jnp.arange(Z * X) // X)[:, None]
             == (jnp.arange(C * Z) % Z)[None, :]).astype(jnp.float32)      # (Z*X, C*Z)
    csum = ((jnp.arange(C * Z) // Z)[:, None]
            == jnp.arange(C)[None, :]).astype(jnp.float32)                 # (C*Z, C)
    return dict(wexp=wexp, cbias=cbias, gamma=gamma, beta=beta, pgn=pgn,
                fcy=fcy, fcyb=fcyb, zmask=zmask, csum=csum)


# ------------------------------------ Forward ------------------------------------
def dense_transformer_forward(features, calib, prep):
    B, Cin, H, W = features.shape
    Hc, C, Z, X = IN_HEIGHT, CHANNELS, Z_OUT, X_OUT
    HcCin, CHc, CZ, ZX = Cin * Hc, C * Hc, C * Z, Z * X

    xr = _crop_to_rows(features, calib)                        # (B, W, Cin*Hc)
    wx = _width_interp_matrix(calib.astype(jnp.float32), W)    # (B, Z*X, W)
    inv_count = 1.0 / float((C // GN_GROUPS) * Hc * W)

    kernel = partial(_dense_transformer_kernel, inv_count=inv_count)
    out = pl.pallas_call(
        kernel,
        out_shape=jax.ShapeDtypeStruct((B, ZX, C), jnp.float32),
        grid=(B,),
        in_specs=[
            pl.BlockSpec((None, W, HcCin), lambda i: (i, 0, 0)),   # cropped input rows
            pl.BlockSpec((HcCin, CHc), lambda i: (0, 0)),          # expanded conv weight
            pl.BlockSpec((1, CHc), lambda i: (0, 0)),              # conv bias
            pl.BlockSpec((1, CHc), lambda i: (0, 0)),              # GN gamma
            pl.BlockSpec((1, CHc), lambda i: (0, 0)),              # GN beta
            pl.BlockSpec((CHc, CHc), lambda i: (0, 0)),            # GN group-sum matrix
            pl.BlockSpec((CHc, CZ), lambda i: (0, 0)),             # fc (+depth interp) weight
            pl.BlockSpec((1, CZ), lambda i: (0, 0)),               # fc (+depth interp) bias
            pl.BlockSpec((None, ZX, W), lambda i: (i, 0, 0)),      # width interp weights
            pl.BlockSpec((ZX, CZ), lambda i: (0, 0)),              # z-selection mask
            pl.BlockSpec((CZ, C), lambda i: (0, 0)),               # channel-block sum
        ],
        out_specs=pl.BlockSpec((None, ZX, C), lambda i: (i, 0, 0)),
        compiler_params=pltpu.CompilerParams(dimension_semantics=("parallel",)),
    )(xr, prep["wexp"], prep["cbias"], prep["gamma"], prep["beta"], prep["pgn"],
      prep["fcy"], prep["fcyb"], wx, prep["zmask"], prep["csum"])

    # (B, Z*X, C) -> (B, C, Z, X)  (tiny 8 KiB/batch transpose, outside the kernel)
    return out.transpose(0, 2, 1).reshape(B, C, Z, X)


# ------------------------------ Parameter init ----------------------------------
def init_params(key):
    k = jax.random.split(key, 6)
    conv_w = 0.1 * jax.random.normal(k[0], (IN_CHANNELS, CHANNELS), jnp.float32)
    conv_b = 0.1 * jax.random.normal(k[1], (CHANNELS,), jnp.float32)
    gn_gamma = 1.0 + 0.1 * jax.random.normal(k[2], (CHANNELS,), jnp.float32)
    gn_beta = 0.1 * jax.random.normal(k[3], (CHANNELS,), jnp.float32)
    fc_in = CHANNELS * IN_HEIGHT
    fc_out = CHANNELS * OUT_DEPTH
    fc_w = (1.0 / math.sqrt(fc_in)) * jax.random.normal(k[4], (fc_out, fc_in), jnp.float32)
    fc_b = 0.1 * jax.random.normal(k[5], (fc_out,), jnp.float32)
    return dict(conv_w=conv_w, conv_b=conv_b, gn_gamma=gn_gamma, gn_beta=gn_beta,
                fc_w=fc_w, fc_b=fc_b)


# ------------------------------ Pure-JAX reference -------------------------------
def reference_forward(features, calib, params):
    B, Cin, H, W = features.shape

    def crop_one(fmap, cal):
        fy = cal[1, 1]
        cy = cal[1, 2]
        vmid = YMID * fy / ZMIN + cy
        vmin = jnp.floor(vmid - IN_HEIGHT / 2.0).astype(jnp.int32)
        rows = jnp.arange(IN_HEIGHT, dtype=jnp.int32) + vmin
        valid = (rows >= 0) & (rows < H)
        g = fmap[:, jnp.clip(rows, 0, H - 1), :]
        return g * valid[None, :, None].astype(fmap.dtype)

    cropped = jax.vmap(crop_one)(features, calib)                       # (B, Cin, Hc, W)
    h = jnp.einsum("bihw,ic->bchw", cropped, params["conv_w"],
                   precision=jax.lax.Precision.HIGHEST)
    h = h + params["conv_b"][None, :, None, None]
    cpg = CHANNELS // GN_GROUPS
    hg = h.reshape(B, GN_GROUPS, cpg, IN_HEIGHT, W)
    mean = hg.mean(axis=(2, 3, 4), keepdims=True)
    var = ((hg - mean) ** 2).mean(axis=(2, 3, 4), keepdims=True)
    hn = ((hg - mean) / jnp.sqrt(var + GN_EPS)).reshape(B, CHANNELS, IN_HEIGHT, W)
    hn = (hn * params["gn_gamma"][None, :, None, None]
          + params["gn_beta"][None, :, None, None])
    feat = jnp.maximum(hn, 0.0)
    flat = feat.reshape(B, CHANNELS * IN_HEIGHT, W)
    bev = jnp.einsum("oi,biw->bow", params["fc_w"], flat,
                     precision=jax.lax.Precision.HIGHEST) + params["fc_b"][None, :, None]
    bev = bev.reshape(B, CHANNELS, OUT_DEPTH, W)
    # gather-based grid_sample reference (bilinear, zeros, align_corners=False)
    cal2 = calib[:, jnp.array([0, 2])][:, :, jnp.array([0, 2])]
    cam = jnp.einsum("bij,zxj->bzxi", cal2, BEV_GRID)
    u = cam[..., 0] / cam[..., 1]
    u = u / W * 2.0 - 1.0
    zc = (cam[..., 1] - ZMIN) / (ZMAX - ZMIN) * 2.0 - 1.0
    gc = jnp.clip(jnp.stack([u, zc], axis=-1), -1.1, 1.1)
    ix = ((gc[..., 0] + 1.0) * W - 1.0) / 2.0
    iy = ((gc[..., 1] + 1.0) * OUT_DEPTH - 1.0) / 2.0
    x0 = jnp.floor(ix).astype(jnp.int32); x1 = x0 + 1
    y0 = jnp.floor(iy).astype(jnp.int32); y1 = y0 + 1
    wx1 = ix - x0; wx0 = 1.0 - wx1
    wy1 = iy - y0; wy0 = 1.0 - wy1
    bidx = jnp.arange(B)[:, None, None]

    def gather(xi, yi):
        valid = ((xi >= 0) & (xi < W) & (yi >= 0) & (yi < OUT_DEPTH)).astype(jnp.float32)
        v = bev[bidx, :, jnp.clip(yi, 0, OUT_DEPTH - 1), jnp.clip(xi, 0, W - 1)]
        return v * valid[..., None]

    out = (gather(x0, y0) * (wx0 * wy0)[..., None]
           + gather(x1, y0) * (wx1 * wy0)[..., None]
           + gather(x0, y1) * (wx0 * wy1)[..., None]
           + gather(x1, y1) * (wx1 * wy1)[..., None])
    return out.transpose(0, 3, 1, 2)


# ------------------------------------ Main ---------------------------------------
if __name__ == "__main__":
    key = jax.random.PRNGKey(0)
    kf, kp = jax.random.split(key)
    B, H, W = 2, 16, 16
    features = jax.random.normal(kf, (B, IN_CHANNELS, H, W), jnp.float32)
    # calib = [[fx, 0, cx], [0, fy, cy], [0, 0, 1]]; batch 1 crops partly off the image.
    calib = jnp.array(
        [[[4.0, 0.0, 8.0], [0.0, 4.0, 8.0], [0.0, 0.0, 1.0]],
         [[4.0, 0.0, 8.0], [0.0, 4.0, 2.5], [0.0, 0.0, 1.0]]], jnp.float32)
    params = init_params(kp)
    prep = prepare_params(params)          # hoisted static operand construction

    fwd = jax.jit(dense_transformer_forward)
    out = jax.block_until_ready(fwd(features, calib, prep))

    assert out.shape == (B, CHANNELS, Z_OUT, X_OUT), out.shape
    ref = reference_forward(features, calib, params)
    if not jnp.allclose(out, ref, rtol=2e-3, atol=2e-3):
        raise AssertionError(
            f"mismatch vs reference, max abs err = {float(jnp.max(jnp.abs(out - ref)))}")
    print("KERNEL_OK")
</pallas_src>

<mosaic_0001>
module attributes {stable_mosaic.version = 11 : i64} {
  func.func @_dense_transformer_kernel(%arg0: i32, %arg1: memref<1x16x64xf32, #tpu.memory_space<vmem>>, %arg2: memref<64x256xf32, #tpu.memory_space<vmem>>, %arg3: memref<1x256xf32, #tpu.memory_space<vmem>>, %arg4: memref<1x256xf32, #tpu.memory_space<vmem>>, %arg5: memref<1x256xf32, #tpu.memory_space<vmem>>, %arg6: memref<256x256xf32, #tpu.memory_space<vmem>>, %arg7: memref<256x256xf32, #tpu.memory_space<vmem>>, %arg8: memref<1x256xf32, #tpu.memory_space<vmem>>, %arg9: memref<1x64x16xf32, #tpu.memory_space<vmem>>, %arg10: memref<64x256xf32, #tpu.memory_space<vmem>>, %arg11: memref<256x32xf32, #tpu.memory_space<vmem>>, %arg12: memref<1x64x32xf32, #tpu.memory_space<vmem>>) attributes {dimension_semantics = [#tpu.dimension_semantics<parallel>], iteration_bounds = array<i64: 2>, scalar_prefetch = 0 : i64, scratch_operands = 0 : i64, tpu.core_type = #tpu.core_type<tc>, window_params = [{transform_indices = @transform_0, window_bounds = array<i64: 1, 16, 64>}, {pipeline_mode = #tpu.pipeline_mode<synchronous>, transform_indices = @transform_1, window_bounds = array<i64: 64, 256>}, {pipeline_mode = #tpu.pipeline_mode<synchronous>, transform_indices = @transform_2, window_bounds = array<i64: 1, 256>}, {pipeline_mode = #tpu.pipeline_mode<synchronous>, transform_indices = @transform_3, window_bounds = array<i64: 1, 256>}, {pipeline_mode = #tpu.pipeline_mode<synchronous>, transform_indices = @transform_4, window_bounds = array<i64: 1, 256>}, {pipeline_mode = #tpu.pipeline_mode<synchronous>, transform_indices = @transform_5, window_bounds = array<i64: 256, 256>}, {pipeline_mode = #tpu.pipeline_mode<synchronous>, transform_indices = @transform_6, window_bounds = array<i64: 256, 256>}, {pipeline_mode = #tpu.pipeline_mode<synchronous>, transform_indices = @transform_7, window_bounds = array<i64: 1, 256>}, {transform_indices = @transform_8, window_bounds = array<i64: 1, 64, 16>}, {pipeline_mode = #tpu.pipeline_mode<synchronous>, transform_indices = @transform_9, window_bounds = array<i64: 64, 256>}, {pipeline_mode = #tpu.pipeline_mode<synchronous>, transform_indices = @transform_10, window_bounds = array<i64: 256, 32>}, {transform_indices = @transform_11, window_bounds = array<i64: 1, 64, 32>}]} {
    %c0 = arith.constant 0 : index
    %c0_0 = arith.constant 0 : index
    %c0_1 = arith.constant 0 : index
    %0 = vector.load %arg1[%c0, %c0_0, %c0_1] : memref<1x16x64xf32, #tpu.memory_space<vmem>>, vector<1x16x64xf32>
    %1 = vector.shape_cast %0 : vector<1x16x64xf32> to vector<16x64xf32>
    %c0_2 = arith.constant 0 : index
    %c0_3 = arith.constant 0 : index
    %2 = vector.load %arg2[%c0_2, %c0_3] : memref<64x256xf32, #tpu.memory_space<vmem>>, vector<64x256xf32>
    %cst = arith.constant dense<0.000000e+00> : vector<16x256xf32>
    %3 = tpu.matmul %1, %2, %cst {dimension_numbers = #tpu.dot_dimension_numbers<[1], [0], [0], [1], [0, 0, 1, 1], [], []>} : vector<16x64xf32>, vector<64x256xf32>, vector<16x256xf32> -> vector<16x256xf32>
    %c0_4 = arith.constant 0 : index
    %c0_5 = arith.constant 0 : index
    %4 = vector.load %arg3[%c0_4, %c0_5] : memref<1x256xf32, #tpu.memory_space<vmem>>, vector<1x256xf32>
    %5 = vector.broadcast %4 : vector<1x256xf32> to vector<16x256xf32>
    %6 = arith.addf %3, %5 : vector<16x256xf32>
    %cst_6 = arith.constant dense<0.000000e+00> : vector<256xf32>
    %7 = vector.multi_reduction <add>, %6, %cst_6 [0] : vector<16x256xf32> to vector<256xf32>
    %8 = vector.shape_cast %7 : vector<256xf32> to vector<1x256xf32>
    %9 = arith.mulf %6, %6 : vector<16x256xf32>
    %cst_7 = arith.constant dense<0.000000e+00> : vector<256xf32>
    %10 = vector.multi_reduction <add>, %9, %cst_7 [0] : vector<16x256xf32> to vector<256xf32>
    %11 = vector.shape_cast %10 : vector<256xf32> to vector<1x256xf32>
    %c0_8 = arith.constant 0 : index
    %c0_9 = arith.constant 0 : index
    %12 = vector.load %arg6[%c0_8, %c0_9] : memref<256x256xf32, #tpu.memory_space<vmem>>, vector<256x256xf32>
    %cst_10 = arith.constant dense<0.000000e+00> : vector<1x256xf32>
    %13 = tpu.matmul %8, %12, %cst_10 {dimension_numbers = #tpu.dot_dimension_numbers<[1], [0], [0], [1], [0, 0, 1, 1], [], []>} : vector<1x256xf32>, vector<256x256xf32>, vector<1x256xf32> -> vector<1x256xf32>
    %cst_11 = arith.constant 3.906250e-03 : f32
    %14 = vector.broadcast %cst_11 : f32 to vector<1x256xf32>
    %15 = arith.mulf %13, %14 : vector<1x256xf32>
    %c0_12 = arith.constant 0 : index
    %c0_13 = arith.constant 0 : index
    %16 = vector.load %arg6[%c0_12, %c0_13] : memref<256x256xf32, #tpu.memory_space<vmem>>, vector<256x256xf32>
    %cst_14 = arith.constant dense<0.000000e+00> : vector<1x256xf32>
    %17 = tpu.matmul %11, %16, %cst_14 {dimension_numbers = #tpu.dot_dimension_numbers<[1], [0], [0], [1], [0, 0, 1, 1], [], []>} : vector<1x256xf32>, vector<256x256xf32>, vector<1x256xf32> -> vector<1x256xf32>
    %cst_15 = arith.constant 3.906250e-03 : f32
    %18 = vector.broadcast %cst_15 : f32 to vector<1x256xf32>
    %19 = arith.mulf %17, %18 : vector<1x256xf32>
    %20 = arith.mulf %15, %15 : vector<1x256xf32>
    %21 = arith.subf %19, %20 : vector<1x256xf32>
    %cst_16 = arith.constant 9.99999974E-6 : f32
    %22 = vector.broadcast %cst_16 : f32 to vector<1x256xf32>
    %23 = arith.addf %21, %22 : vector<1x256xf32>
    %24 = math.rsqrt %23 : vector<1x256xf32>
    %25 = vector.broadcast %15 : vector<1x256xf32> to vector<16x256xf32>
    %26 = arith.subf %6, %25 : vector<16x256xf32>
    %27 = vector.broadcast %24 : vector<1x256xf32> to vector<16x256xf32>
    %28 = arith.mulf %26, %27 : vector<16x256xf32>
    %c0_17 = arith.constant 0 : index
    %c0_18 = arith.constant 0 : index
    %29 = vector.load %arg4[%c0_17, %c0_18] : memref<1x256xf32, #tpu.memory_space<vmem>>, vector<1x256xf32>
    %30 = vector.broadcast %29 : vector<1x256xf32> to vector<16x256xf32>
    %31 = arith.mulf %28, %30 : vector<16x256xf32>
    %c0_19 = arith.constant 0 : index
    %c0_20 = arith.constant 0 : index
    %32 = vector.load %arg5[%c0_19, %c0_20] : memref<1x256xf32, #tpu.memory_space<vmem>>, vector<1x256xf32>
    %33 = vector.broadcast %32 : vector<1x256xf32> to vector<16x256xf32>
    %34 = arith.addf %31, %33 : vector<16x256xf32>
    %cst_21 = arith.constant 0.000000e+00 : f32
    %35 = vector.broadcast %cst_21 : f32 to vector<16x256xf32>
    %36 = arith.maximumf %34, %35 : vector<16x256xf32>
    %c0_22 = arith.constant 0 : index
    %c0_23 = arith.constant 0 : index
    %37 = vector.load %arg7[%c0_22, %c0_23] : memref<256x256xf32, #tpu.memory_space<vmem>>, vector<256x256xf32>
    %cst_24 = arith.constant dense<0.000000e+00> : vector<16x256xf32>
    %38 = tpu.matmul %36, %37, %cst_24 {dimension_numbers = #tpu.dot_dimension_numbers<[1], [0], [0], [1], [0, 0, 1, 1], [], []>} : vector<16x256xf32>, vector<256x256xf32>, vector<16x256xf32> -> vector<16x256xf32>
    %c0_25 = arith.constant 0 : index
    %c0_26 = arith.constant 0 : index
    %39 = vector.load %arg8[%c0_25, %c0_26] : memref<1x256xf32, #tpu.memory_space<vmem>>, vector<1x256xf32>
    %40 = vector.broadcast %39 : vector<1x256xf32> to vector<16x256xf32>
    %41 = arith.addf %38, %40 : vector<16x256xf32>
    %c0_27 = arith.constant 0 : index
    %c0_28 = arith.constant 0 : index
    %c0_29 = arith.constant 0 : index
    %42 = vector.load %arg9[%c0_27, %c0_28, %c0_29] : memref<1x64x16xf32, #tpu.memory_space<vmem>>, vector<1x64x16xf32>
    %43 = vector.shape_cast %42 : vector<1x64x16xf32> to vector<64x16xf32>
    %cst_30 = arith.constant dense<0.000000e+00> : vector<64x256xf32>
    %44 = tpu.matmul %43, %41, %cst_30 {dimension_numbers = #tpu.dot_dimension_numbers<[1], [0], [0], [1], [0, 0, 1, 1], [], []>} : vector<64x16xf32>, vector<16x256xf32>, vector<64x256xf32> -> vector<64x256xf32>
    %c0_31 = arith.constant 0 : index
    %c0_32 = arith.constant 0 : index
    %45 = vector.load %arg10[%c0_31, %c0_32] : memref<64x256xf32, #tpu.memory_space<vmem>>, vector<64x256xf32>
    %46 = arith.mulf %44, %45 : vector<64x256xf32>
    %c0_33 = arith.constant 0 : index
    %c0_34 = arith.constant 0 : index
    %47 = vector.load %arg11[%c0_33, %c0_34] : memref<256x32xf32, #tpu.memory_space<vmem>>, vector<256x32xf32>
    %cst_35 = arith.constant dense<0.000000e+00> : vector<64x32xf32>
    %48 = tpu.matmul %46, %47, %cst_35 {dimension_numbers = #tpu.dot_dimension_numbers<[1], [0], [0], [1], [0, 0, 1, 1], [], []>} : vector<64x256xf32>, vector<256x32xf32>, vector<64x32xf32> -> vector<64x32xf32>
    %c0_36 = arith.constant 0 : index
    %c0_37 = arith.constant 0 : index
    %c0_38 = arith.constant 0 : index
    %49 = vector.load %arg12[%c0_36, %c0_37, %c0_38] : memref<1x64x32xf32, #tpu.memory_space<vmem>>, vector<1x64x32xf32>
    %50 = vector.shape_cast %49 : vector<1x64x32xf32> to vector<64x32xf32>
    %51 = vector.shape_cast %48 : vector<64x32xf32> to vector<1x64x32xf32>
    tpu.vector_store %arg12[%c0_36, %c0_37, %c0_38], %51 {strides = array<i32>} : memref<1x64x32xf32, #tpu.memory_space<vmem>>, vector<1x64x32xf32>,
    return
  }
  func.func @transform_0(%arg0: i32) -> (i32, i32, i32) {
    %c0_i32 = arith.constant 0 : i32
    %c0_i32_0 = arith.constant 0 : i32
    %c0_i32_1 = arith.constant 0 : i32
    return %arg0, %c0_i32, %c0_i32_0 : i32, i32, i32
  }
  func.func @transform_1(%arg0: i32) -> (i32, i32) {
    %c0_i32 = arith.constant 0 : i32
    %c0_i32_0 = arith.constant 0 : i32
    %c0_i32_1 = arith.constant 0 : i32
    return %c0_i32, %c0_i32_0 : i32, i32
  }
  func.func @transform_2(%arg0: i32) -> (i32, i32) {
    %c0_i32 = arith.constant 0 : i32
    %c0_i32_0 = arith.constant 0 : i32
    %c0_i32_1 = arith.constant 0 : i32
    return %c0_i32, %c0_i32_0 : i32, i32
  }
  func.func @transform_3(%arg0: i32) -> (i32, i32) {
    %c0_i32 = arith.constant 0 : i32
    %c0_i32_0 = arith.constant 0 : i32
    %c0_i32_1 = arith.constant 0 : i32
    return %c0_i32, %c0_i32_0 : i32, i32
  }
  func.func @transform_4(%arg0: i32) -> (i32, i32) {
    %c0_i32 = arith.constant 0 : i32
    %c0_i32_0 = arith.constant 0 : i32
    %c0_i32_1 = arith.constant 0 : i32
    return %c0_i32, %c0_i32_0 : i32, i32
  }
  func.func @transform_5(%arg0: i32) -> (i32, i32) {
    %c0_i32 = arith.constant 0 : i32
    %c0_i32_0 = arith.constant 0 : i32
    %c0_i32_1 = arith.constant 0 : i32
    return %c0_i32, %c0_i32_0 : i32, i32
  }
  func.func @transform_6(%arg0: i32) -> (i32, i32) {
    %c0_i32 = arith.constant 0 : i32
    %c0_i32_0 = arith.constant 0 : i32
    %c0_i32_1 = arith.constant 0 : i32
    return %c0_i32, %c0_i32_0 : i32, i32
  }
  func.func @transform_7(%arg0: i32) -> (i32, i32) {
    %c0_i32 = arith.constant 0 : i32
    %c0_i32_0 = arith.constant 0 : i32
    %c0_i32_1 = arith.constant 0 : i32
    return %c0_i32, %c0_i32_0 : i32, i32
  }
  func.func @transform_8(%arg0: i32) -> (i32, i32, i32) {
    %c0_i32 = arith.constant 0 : i32
    %c0_i32_0 = arith.constant 0 : i32
    %c0_i32_1 = arith.constant 0 : i32
    return %arg0, %c0_i32, %c0_i32_0 : i32, i32, i32
  }
  func.func @transform_9(%arg0: i32) -> (i32, i32) {
    %c0_i32 = arith.constant 0 : i32
    %c0_i32_0 = arith.constant 0 : i32
    %c0_i32_1 = arith.constant 0 : i32
    return %c0_i32, %c0_i32_0 : i32, i32
  }
  func.func @transform_10(%arg0: i32) -> (i32, i32) {
    %c0_i32 = arith.constant 0 : i32
    %c0_i32_0 = arith.constant 0 : i32
    %c0_i32_1 = arith.constant 0 : i32
    return %c0_i32, %c0_i32_0 : i32, i32
  }
  func.func @transform_11(%arg0: i32) -> (i32, i32, i32) {
    %c0_i32 = arith.constant 0 : i32
    %c0_i32_0 = arith.constant 0 : i32
    %c0_i32_1 = arith.constant 0 : i32
    return %arg0, %c0_i32, %c0_i32_0 : i32, i32, i32
  }
}

</mosaic_0001>

<bundles_post_ra>
// kernel: dense_transformer_forward.1
= control target key start
LH: loop header
LB: loop body
LE: loop exit
PB: predicated region body
PF: predicated region fallthrough
CT: control target
= control target key end

     0   :  { %16 = vsyncpa [#allocation3], 0  ;;  %s2439_s0 = inlined_call_operand.vmem [shape: f32[2,16,64], index: 0, kind: input, shape index: {}]   ;;  %s2440_s1 = inlined_call_operand.vmem [shape: f32[64,256], index: 1, kind: input, shape index: {}]   ;;  %s2441_s2 = inlined_call_operand.vmem [shape: f32[1,256], index: 2, kind: input, shape index: {}]   ;;  %s2442_s3 = inlined_call_operand.vmem [shape: f32[1,256], index: 3, kind: input, shape index: {}]   ;;  %s2443_s4 = inlined_call_operand.vmem [shape: f32[1,256], index: 4, kind: input, shape index: {}]   ;;  %s2444_s5 = inlined_call_operand.vmem [shape: f32[256,256], index: 5, kind: input, shape index: {}]   ;;  %s2445_s6 = inlined_call_operand.vmem [shape: f32[256,256], index: 6, kind: input, shape index: {}]   ;;  %s2446_s7 = inlined_call_operand.vmem [shape: f32[1,256], index: 7, kind: input, shape index: {}]   ;;  %s2447_s8 = inlined_call_operand.vmem [shape: f32[2,64,16], index: 8, kind: input, shape index: {}]   ;;  %s2448_s9 = inlined_call_operand.vmem [shape: f32[64,256], index: 9, kind: input, shape index: {}]   ;;  %s2449_s10 = inlined_call_operand.vmem [shape: f32[256,32], index: 10, kind: input, shape index: {}]   ;;  %s2450_s11 = inlined_call_operand.hbm [shape: f32[2,64,32], index: 11, kind: output, shape index: {}]  }
   0x1   :  { %18 = vsyncpa [#allocation3 + $0x1], 0  ;;  %s1649_s17 = smov 0   ;;  %s1651_s18 = smov 0  }
   0x2   :  { %s1653_s19 = smov 0   ;;  %s1655_s20 = smov 0  }
   0x3 LB: > { %2454 = sst [smem:[#allocation5_spill]] %s1579_s19  ;;  %s1670_s21 = sadd.s32 4294967295, %s1583_s20   ;;  %s1583_s20 = sphi %s1655_s20, %s2459_s20   ;;  %s1579_s19 = sphi %s1653_s19, %s2461_s19   ;;  %s1575_s18 = sphi %s1651_s18, %s2463_s18   ;;  %s1571_s17 = sphi %s1649_s17, %s2462_s17  }
   0x4   : > { %s1394_s22 = sadd.s32 4294967294, %s1583_s20   ;;  %s1674_s23 = sadd.s32 1, %s1583_s20  }
   0x5   : > { %2455 = sst [smem:[#allocation6_spill]] %s1674_s23  ;;  %s272_s24 = sadd.s32 1, %s1579_s19 }
   0x6   : > { %s269_s25 = ssub.s32 %s1583_s20, %s1674_s23  ;;  %p282_p0 = scmp.ne.s32.totalorder %s1579_s19, %s1575_s18 }
   0x7   : > { %p270_p1 = scmp.eq.s32.totalorder %s269_s25, 0  ;;  %p283_p2 = scmp.eq.s32.totalorder %s1670_s21, 1 }
   0x8   : > { %p288_p3 = scmp.ne.s32.totalorder %s1575_s18, %s1571_s17  ;;  %p289_p4 = scmp.eq.s32.totalorder %s1394_s22, 1 }
   0x9   : > { %s1685_s26 = scalar_select %p270_p1, %s1579_s19, %s272_s24  }
   0xa   : > { %p1687_p5 = por %p283_p2, %p282_p0  ;;  %p1691_p6 = por %p289_p4, %p288_p3 }
   0xb   : > { %2456 = sst [smem:[#allocation7_spill]] %s1685_s26  ;;  %p1397_p7 = scmp.ge.s32.totalorder %s1583_s20, 1 }
   0xc   : > { %p350_p8 = scmp.lt.s32.totalorder %s1583_s20, 3 }
   0xe   : > { %p351_p9 = pnand %p1397_p7, %p350_p8 }
   0xf   : > { %p395_p10 = scmp.lt.s32.totalorder (!%p351_p9), %s1670_s21, 1  ;;  %s1420_s29 = sshll.u32 (!%p351_p9), %s1670_s21, 10 }
  0x10   : > { %354 = sbr.rel (%p351_p9) target bundleno = 1124 (0x464), region = 64  ;;  %s2391_s13 = scalar_lea.hbm (!%p351_p9), %s2450_s11, %s1420_s29 }
  0x15   : > { %v422_v0 = vld [vmem:[%s2440_s1 + $0x78] sm:$0xff]  ;;  %v421_v1 = vld [vmem:[%s2440_s1 + $0x70] sm:$0xff]  ;;  %v420_v2 = vld [vmem:[%s2440_s1 + $0x68] sm:$0xff]  ;;  %v1585_v4 = vmov 0.0   ;;  %s1721_s14 = scalar_select %p395_p10, %s1670_s21, 1  ;;  %vm435_vm0 = vcmask 523264  }
  0x16   : > { %458 = vmatprep.subr.mxu0 %v422_v0  ;;  %v419_v3 = vld [vmem:[%s2440_s1 + $0x60] sm:$0xff]  ;;  %506 = vmatprep.mubr.f32.mxu0 %v1585_v4  ;;  %v418_v5 = vld [vmem:[%s2440_s1 + $0x58] sm:$0xff]  ;;  %v417_v6 = vld [vmem:[%s2440_s1 + $0x50] sm:$0xff]  ;;  %vm990_vm1 = vcmask 130048   ;;  %vm1297_vm2 = vcmask 261120  }
  0x17   : > { %459 = vmatpush1.msra.mxu0 %v421_v1  ;;  %v416_v7 = vld [vmem:[%s2440_s1 + $0x48] sm:$0xff]  ;;  %v415_v8 = vld [vmem:[%s2440_s1 + $0x40] sm:$0xff]  ;;  %v582_v9 = vld [vmem:[%s2444_s5 + $0xf8] sm:$0xff]  ;;  %s1418_s26 = sshll.u32 %s1721_s14, 4  ;;  %s1419_s24 = sshll.u32 %s1721_s14, 6 }
  0x18   : > { %460 = vmatprep.subr.mxu0 %v420_v2  ;;  %v581_v10 = vld [vmem:[%s2444_s5 + $0xf0] sm:$0xff]  ;;  %v414_v11 = vld [vmem:[%s2440_s1 + $0x38] sm:$0xff]  ;;  %615 = vmatprep.subr.mxu1 %v582_v9  ;;  %v580_v12 = vld [vmem:[%s2444_s5 + $0xe8] sm:$0xff]  ;;  %s399_s22 = scalar_lea.vmem %s2439_s0, %s1418_s26  ;;  %s2198_s30 = scalar_lea.vmem %s2447_s8, %s1419_s24 }
  0x19   : > { %461 = vmatpush1.msra.mxu0 %v419_v3  ;;  %v413_v13 = vld [vmem:[%s2440_s1 + $0x30] sm:$0xff]  ;;  %616 = vmatpush1.msra.mxu1 %v581_v10  ;;  %v579_v14 = vld [vmem:[%s2444_s5 + $0xe0] sm:$0xff]  ;;  %v578_v15 = vld [vmem:[%s2444_s5 + $0xd8] sm:$0xff]  ;;  %s392_s24 = sand.u32 1, %s1575_s18  }
  0x1a   : > { %462 = vmatprep.subr.mxu0 %v418_v5  ;;  %v412_v16 = vld [vmem:[%s2440_s1 + $0x28] sm:$0xff]  ;;  %617 = vmatprep.subr.mxu1 %v580_v12  ;;  %v577_v17 = vld [vmem:[%s2444_s5 + $0xd0] sm:$0xff]  ;;  %v411_v18 = vld [vmem:[%s2440_s1 + $0x20] sm:$0xff]  ;;  %s1398_s25 = sshll.u32 %s392_s24, 6  ;;  %s2399_s21 = scalar_lea.sflag [#allocation3], %s392_s24 }
  0x1b   : > { %463 = vmatpush1.msra.mxu0 %v417_v6  ;;  %618 = vmatpush1.msra.mxu1 %v579_v14  ;;  %v576_v19 = vld [vmem:[%s2444_s5 + $0xc8] sm:$0xff]  ;;  %v410_v20 = vld [vmem:[%s2440_s1 + $0x18] sm:$0xff]  ;;  %v575_v21 = vld [vmem:[%s2444_s5 + $0xc0] sm:$0xff] }
  0x1c   : > { %464 = vmatprep.subr.mxu0 %v416_v7  ;;  %619 = vmatprep.subr.mxu1 %v578_v15  ;;  %v409_v22 = vld [vmem:[%s2440_s1 + $0x10] sm:$0xff]  ;;  %v574_v23 = vld [vmem:[%s2444_s5 + $0xb8] sm:$0xff]  ;;  %v408_v24 = vld [vmem:[%s2440_s1 + $0x8] sm:$0xff] }
  0x1d   : > { %465 = vmatpush1.msra.mxu0 %v415_v8  ;;  %620 = vmatpush1.msra.mxu1 %v577_v17  ;;  %v573_v25 = vld [vmem:[%s2444_s5 + $0xb0] sm:$0xff]  ;;  %v407_v26 = vld [vmem:[%s2440_s1] sm:$0xff]  ;;  %v572_v27 = vld [vmem:[%s2444_s5 + $0xa8] sm:$0xff] }
  0x1e   : > { %466 = vmatprep.subr.mxu0 %v414_v11  ;;  %621 = vmatprep.subr.mxu1 %v576_v19  ;;  %v405_v28 = vld [vmem:[%s399_s22] sm:$0xff]  ;;  %v570_v30 = vld [vmem:[%s2444_s5 + $0x98] sm:$0xff]  ;;  %v406_v31 = vld [vmem:[%s399_s22 + $0x8] sm:$0xff]  ;;  %s1586_s22 = smov [#allocation2]  }
  0x1f   : > { %467 = vmatpush1.msra.mxu0 %v413_v13  ;;  %622 = vmatpush1.msra.mxu1 %v575_v21  ;;  %v571_v29 = vld [vmem:[%s2444_s5 + $0xa0] sm:$0xff]  ;;  %v569_v32 = vld [vmem:[%s2444_s5 + $0x90] sm:$0xff]  ;;  %v568_v33 = vld [vmem:[%s2444_s5 + $0x88] sm:$0xff]  ;;  %s1527_s15 = sshll.u32 %s1586_s22, 4  ;;  %s1528_s15 = int_to_ptr.vmem [resolvable:$false] %s1527_s15 }
  0x20   : > { %468 = vmatprep.subr.mxu0 %v412_v16  ;;  %623 = vmatprep.subr.mxu1 %v574_v23  ;;  %v567_v34 = vld [vmem:[%s2444_s5 + $0x80] sm:$0xff]  ;;  %v566_v35 = vld [vmem:[%s2444_s5 + $0x78] sm:$0xff]  ;;  %v565_v36 = vld [vmem:[%s2444_s5 + $0x70] sm:$0xff]  ;;  %s1529_s23 = scalar_lea.vmem %s1528_s15, 2048 }
  0x21   : > { %469 = vmatpush1.msra.mxu0 %v411_v18  ;;  %624 = vmatpush1.msra.mxu1 %v573_v25  ;;  %v564_v37 = vld [vmem:[%s2444_s5 + $0x68] sm:$0xff]  ;;  %v563_v38 = vld [vmem:[%s2444_s5 + $0x60] sm:$0xff]  ;;  %v562_v39 = vld [vmem:[%s2444_s5 + $0x58] sm:$0xff] }
  0x22   : > { %470 = vmatprep.subr.mxu0 %v410_v20  ;;  %625 = vmatprep.subr.mxu1 %v572_v27  ;;  %v561_v40 = vld [vmem:[%s2444_s5 + $0x50] sm:$0xff]  ;;  %v560_v41 = vld [vmem:[%s2444_s5 + $0x48] sm:$0xff]  ;;  %v559_v42 = vld [vmem:[%s2444_s5 + $0x40] sm:$0xff] }
  0x23   : > { %471 = vmatpush1.msra.mxu0 %v409_v22  ;;  %626 = vmatpush1.msra.mxu1 %v571_v29  ;;  %v558_v43 = vld [vmem:[%s2444_s5 + $0x38] sm:$0xff]  ;;  %v557_v44 = vld [vmem:[%s2444_s5 + $0x30] sm:$0xff]  ;;  %v556_v45 = vld [vmem:[%s2444_s5 + $0x28] sm:$0xff] }
  0x24   : > { %472 = vmatprep.subr.mxu0 %v408_v24  ;;  %627 = vmatprep.subr.mxu1 %v570_v30  ;;  %v555_v46 = vld [vmem:[%s2444_s5 + $0x20] sm:$0xff]  ;;  %v554_v47 = vld [vmem:[%s2444_s5 + $0x18] sm:$0xff]  ;;  %v553_v48 = vld [vmem:[%s2444_s5 + $0x10] sm:$0xff] }
  0x25   : > { %473 = vmatpush1.msra.mxu0 %v407_v26  ;;  %628 = vmatpush1.msra.mxu1 %v569_v32  ;;  %v552_v49 = vld [vmem:[%s2444_s5 + $0x8] sm:$0xff]  ;;  %v551_v50 = vld [vmem:[%s2444_s5] sm:$0xff]  ;;  %v614_v51 = vld [vmem:[%s2444_s5 + $0x1f8] sm:$0xff] }
  0x26   : > { %1403 = vmatmul.mubr.msk.f32.vlgmr.msra.gmra.mxu0 %vm435_vm0, %v405_v28  ;;  %688 = vmatprep.subr.mxu0 %v582_v9  ;;  %v613_v52 = vld [vmem:[%s2444_s5 + $0x1f0] sm:$0xff]  ;;  %v612_v53 = vld [vmem:[%s2444_s5 + $0x1e8] sm:$0xff]  ;;  %v611_v54 = vld [vmem:[%s2444_s5 + $0x1e0] sm:$0xff] }
  0x27   : > { %512 = vmatprep.mubr.f32.mxu0 %v1585_v4  ;;  %689 = vmatpush1.msra.mxu0 %v581_v10  ;;  %v610_v55 = vld [vmem:[%s2444_s5 + $0x1d8] sm:$0xff]  ;;  %v609_v56 = vld [vmem:[%s2444_s5 + $0x1d0] sm:$0xff]  ;;  %v608_v57 = vld [vmem:[%s2444_s5 + $0x1c8] sm:$0xff] }
  0x28   : > { %690 = vmatprep.subr.mxu0 %v580_v12  ;;  %629 = vmatprep.subr.mxu1 %v568_v33  ;;  %v607_v58 = vld [vmem:[%s2444_s5 + $0x1c0] sm:$0xff]  ;;  %v606_v59 = vld [vmem:[%s2444_s5 + $0x1b8] sm:$0xff]  ;;  %v605_v60 = vld [vmem:[%s2444_s5 + $0x1b0] sm:$0xff] }
  0x29   : > { %691 = vmatpush1.msra.mxu0 %v579_v14  ;;  %630 = vmatpush1.msra.mxu1 %v567_v34  ;;  %v604_v61 = vld [vmem:[%s2444_s5 + $0x1a8] sm:$0xff]  ;;  %v603_v62 = vld [vmem:[%s2444_s5 + $0x1a0] sm:$0xff]  ;;  %v602_v63 = vld [vmem:[%s2444_s5 + $0x198] sm:$0xff] }
  0x2a   : > { %1404 = vmatmul.mubr.msk.f32.gmra.mxu0 %vm435_vm0, %v406_v31  ;;  %692 = vmatprep.subr.mxu0 %v578_v15  ;;  %v601_v0 = vld [vmem:[%s2444_s5 + $0x190] sm:$0xff]  ;;  %v600_v1 = vld [vmem:[%s2444_s5 + $0x188] sm:$0xff]  ;;  %v599_v2 = vld [vmem:[%s2444_s5 + $0x180] sm:$0xff] }
  0x2b   : > { %693 = vmatpush1.msra.mxu0 %v577_v17  ;;  %631 = vmatprep.subr.mxu1 %v566_v35  ;;  %v598_v3 = vld [vmem:[%s2444_s5 + $0x178] sm:$0xff]  ;;  %v597_v5 = vld [vmem:[%s2444_s5 + $0x170] sm:$0xff]  ;;  %v596_v6 = vld [vmem:[%s2444_s5 + $0x168] sm:$0xff] }
  0x2c   : > { %694 = vmatprep.subr.mxu0 %v576_v19  ;;  %632 = vmatpush1.msra.mxu1 %v565_v36  ;;  %v595_v7 = vld [vmem:[%s2444_s5 + $0x160] sm:$0xff]  ;;  %v594_v8 = vld [vmem:[%s2444_s5 + $0x158] sm:$0xff]  ;;  %v593_v9 = vld [vmem:[%s2444_s5 + $0x150] sm:$0xff] }
  0x2d   : > { %695 = vmatpush1.msra.mxu0 %v575_v21  ;;  %633 = vmatprep.subr.mxu1 %v564_v37  ;;  %v592_v10 = vld [vmem:[%s2444_s5 + $0x148] sm:$0xff]  ;;  %v591_v11 = vld [vmem:[%s2444_s5 + $0x140] sm:$0xff]  ;;  %v590_v12 = vld [vmem:[%s2444_s5 + $0x138] sm:$0xff]  ;;  %v425_v21 = vlaneseq }
  0x2e   : > { %696 = vmatprep.subr.mxu0 %v574_v23  ;;  %634 = vmatpush1.msra.mxu1 %v563_v38  ;;  %v589_v13 = vld [vmem:[%s2444_s5 + $0x130] sm:$0xff]  ;;  %v588_v14 = vld [vmem:[%s2444_s5 + $0x128] sm:$0xff]  ;;  %v587_v15 = vld [vmem:[%s2444_s5 + $0x120] sm:$0xff] }
  0x2f   : > { %697 = vmatpush1.msra.mxu0 %v573_v25  ;;  %635 = vmatprep.subr.mxu1 %v562_v39  ;;  %v586_v16 = vld [vmem:[%s2444_s5 + $0x118] sm:$0xff]  ;;  %v585_v17 = vld [vmem:[%s2444_s5 + $0x110] sm:$0xff]  ;;  %v584_v18 = vld [vmem:[%s2444_s5 + $0x108] sm:$0xff]  ;;  %v426_v22 = vshrl.u32 %v425_v21, 7 }
  0x30   : > { %698 = vmatprep.subr.mxu0 %v572_v27  ;;  %636 = vmatpush1.msra.mxu1 %v561_v40  ;;  %v583_v19 = vld [vmem:[%s2444_s5 + $0x100] sm:$0xff]  ;;  %v860_v20 = vld [vmem:[%s2445_s6 + $0xf8] sm:$0xff]  ;;  %v843_v21 = vld [vmem:[%s2445_s6 + $0x70] sm:$0xff] }
  0x31   : > { %699 = vmatpush1.msra.mxu0 %v571_v29  ;;  %637 = vmatprep.subr.mxu1 %v560_v41  ;;  %v1952_v23 = vsub.s32 0, %v426_v22  ;;  %v423_v24 = vld [vmem:[%s2441_s2] sm:$0x3]  ;;  %v1957_v25 = vsub.s32 1, %v426_v22  ;;  %v842_v22 = vld [vmem:[%s2445_s6 + $0x68] sm:$0xff] }
  0x32   : > { %700 = vmatprep.subr.mxu0 %v570_v30  ;;  %638 = vmatpush1.msra.mxu1 %v559_v42 }
  0x33   : > { %701 = vmatpush1.msra.mxu0 %v569_v32  ;;  %639 = vmatprep.subr.mxu1 %v558_v43  ;;  %v428_v26 = vrot.slane %v423_v24, %v1952_v23  ;;  %v432_v28 = vrot.slane %v423_v24, %v1957_v25  ;;  %v841_v24 = vld [vmem:[%s2445_s6 + $0x60] sm:$0xff] }
  0x34   : > { %702 = vmatprep.subr.mxu0 %v568_v33  ;;  %640 = vmatpush1.msra.mxu1 %v557_v44 }
  0x35   : > { %703 = vmatpush1.msra.mxu0 %v567_v34  ;;  %641 = vmatprep.subr.mxu1 %v556_v45 }
  0x36   : > { %704 = vmatprep.subr.mxu0 %v566_v35  ;;  %642 = vmatpush1.msra.mxu1 %v555_v46 }
  0x37   : > { %705 = vmatpush1.msra.mxu0 %v565_v36  ;;  %643 = vmatprep.subr.mxu1 %v554_v47 }
  0x38   : > { %706 = vmatprep.subr.mxu0 %v564_v37  ;;  %644 = vmatpush1.msra.mxu1 %v553_v48 }
  0x39   : > { %707 = vmatpush1.msra.mxu0 %v563_v38  ;;  %645 = vmatprep.subr.mxu1 %v552_v49 }
  0x3a   : > { %708 = vmatprep.subr.mxu0 %v562_v39  ;;  %646 = vmatpush1.msra.mxu1 %v551_v50 }
  0x3b   : > { %709 = vmatpush1.msra.mxu0 %v561_v40  ;;  %647 = vmatprep.subr.mxu1 %v614_v51 }
  0x3c   : > { %710 = vmatprep.subr.mxu0 %v560_v41  ;;  %648 = vmatpush2.msra.mxu1 %v613_v52 }
  0x3d   : > { %711 = vmatpush1.msra.mxu0 %v559_v42  ;;  %649 = vmatprep.subr.mxu1 %v612_v53 }
  0x3e   : > { %712 = vmatprep.subr.mxu0 %v558_v43  ;;  %650 = vmatpush2.msra.mxu1 %v611_v54 }
  0x3f   : > { %713 = vmatpush1.msra.mxu0 %v557_v44  ;;  %651 = vmatprep.subr.mxu1 %v610_v55 }
  0x40   : > { %714 = vmatprep.subr.mxu0 %v556_v45  ;;  %652 = vmatpush2.msra.mxu1 %v609_v56 }
  0x41   : > { %715 = vmatpush1.msra.mxu0 %v555_v46  ;;  %653 = vmatprep.subr.mxu1 %v608_v57 }
  0x42   : > { %716 = vmatprep.subr.mxu0 %v554_v47  ;;  %654 = vmatpush2.msra.mxu1 %v607_v58 }
  0x43   : > { %717 = vmatpush1.msra.mxu0 %v553_v48  ;;  %655 = vmatprep.subr.mxu1 %v606_v59 }
  0x44   : > { %718 = vmatprep.subr.mxu0 %v552_v49  ;;  %656 = vmatpush2.msra.mxu1 %v605_v60 }
  0x45   : > { %719 = vmatpush1.msra.mxu0 %v551_v50  ;;  %657 = vmatprep.subr.mxu1 %v604_v61 }
  0x46   : > { %720 = vmatprep.subr.mxu0 %v614_v51  ;;  %658 = vmatpush2.msra.mxu1 %v603_v62 }
  0x47   : > { %721 = vmatpush2.msra.mxu0 %v613_v52  ;;  %659 = vmatprep.subr.mxu1 %v602_v63 }
  0x48   : > { %722 = vmatprep.subr.mxu0 %v612_v53  ;;  %660 = vmatpush2.msra.mxu1 %v601_v0 }
  0x49   : > { %723 = vmatpush2.msra.mxu0 %v611_v54  ;;  %661 = vmatprep.subr.mxu1 %v600_v1 }
  0x4a   : > { %724 = vmatprep.subr.mxu0 %v610_v55  ;;  %662 = vmatpush2.msra.mxu1 %v599_v2 }
  0x4b   : > { %725 = vmatpush2.msra.mxu0 %v609_v56  ;;  %663 = vmatprep.subr.mxu1 %v598_v3 }
  0x4c   : > { %726 = vmatprep.subr.mxu0 %v608_v57  ;;  %664 = vmatpush2.msra.mxu1 %v597_v5 }
  0x4d   : > { %727 = vmatpush2.msra.mxu0 %v607_v58  ;;  %665 = vmatprep.subr.mxu1 %v596_v6 }
  0x4e   : > { %728 = vmatprep.subr.mxu0 %v606_v59  ;;  %666 = vmatpush2.msra.mxu1 %v595_v7 }
  0x4f   : > { %729 = vmatpush2.msra.mxu0 %v605_v60  ;;  %667 = vmatprep.subr.mxu1 %v594_v8 }
  0x50   : > { %730 = vmatprep.subr.mxu0 %v604_v61  ;;  %668 = vmatpush2.msra.mxu1 %v593_v9 }
  0x51   : > { %731 = vmatpush2.msra.mxu0 %v603_v62  ;;  %669 = vmatprep.subr.mxu1 %v592_v10 }
  0x52   : > { %732 = vmatprep.subr.mxu0 %v602_v63  ;;  %670 = vmatpush2.msra.mxu1 %v591_v11 }
  0x53   : > { %733 = vmatpush2.msra.mxu0 %v601_v0  ;;  %671 = vmatprep.subr.mxu1 %v590_v12 }
  0x54   : > { %734 = vmatprep.subr.mxu0 %v600_v1  ;;  %672 = vmatpush2.msra.mxu1 %v589_v13 }
  0x55   : > { %735 = vmatpush2.msra.mxu0 %v599_v2  ;;  %673 = vmatprep.subr.mxu1 %v588_v14  ;;  %v859_v2 = vld [vmem:[%s2445_s6 + $0xf0] sm:$0xff] }
  0x56   : > { %736 = vmatprep.subr.mxu0 %v598_v3  ;;  %674 = vmatpush2.msra.mxu1 %v587_v15 }
  0x57   : > { %737 = vmatpush2.msra.mxu0 %v597_v5  ;;  %675 = vmatprep.subr.mxu1 %v586_v16  ;;  %v858_v5 = vld [vmem:[%s2445_s6 + $0xe8] sm:$0xff] }
  0x58   : > { %738 = vmatprep.subr.mxu0 %v596_v6  ;;  %676 = vmatpush2.msra.mxu1 %v585_v17 }
  0x59   : > { %739 = vmatpush2.msra.mxu0 %v595_v7  ;;  %677 = vmatprep.subr.mxu1 %v584_v18  ;;  %v857_v7 = vld [vmem:[%s2445_s6 + $0xe0] sm:$0xff] }
  0x5a   : > { %740 = vmatprep.subr.mxu0 %v594_v8  ;;  %678 = vmatpush2.msra.mxu1 %v583_v19  ;;  %v856_v8 = vld [vmem:[%s2445_s6 + $0xd8] sm:$0xff] }
  0x5b   : > { %741 = vmatpush2.msra.mxu0 %v593_v9  ;;  %905 = vmatprep.subr.mxu1 %v860_v20  ;;  %v855_v9 = vld [vmem:[%s2445_s6 + $0xd0] sm:$0xff]  ;;  %v844_v20 = vld [vmem:[%s2445_s6 + $0x78] sm:$0xff] }
  0x5c   : > { %742 = vmatprep.subr.mxu0 %v592_v10  ;;  %v854_v10 = vld [vmem:[%s2445_s6 + $0xc8] sm:$0xff] }
  0x5d   : > { %743 = vmatpush2.msra.mxu0 %v591_v11  ;;  %v853_v11 = vld [vmem:[%s2445_s6 + $0xc0] sm:$0xff] }
  0x5e   : > { %744 = vmatprep.subr.mxu0 %v590_v12  ;;  %v852_v12 = vld [vmem:[%s2445_s6 + $0xb8] sm:$0xff] }
  0x5f   : > { %745 = vmatpush2.msra.mxu0 %v589_v13  ;;  %v851_v13 = vld [vmem:[%s2445_s6 + $0xb0] sm:$0xff] }
  0x60   : > { %746 = vmatprep.subr.mxu0 %v588_v14  ;;  %v850_v14 = vld [vmem:[%s2445_s6 + $0xa8] sm:$0xff] }
  0x61   : > { %747 = vmatpush2.msra.mxu0 %v587_v15  ;;  %v849_v15 = vld [vmem:[%s2445_s6 + $0xa0] sm:$0xff] }
  0x62   : > { %748 = vmatprep.subr.mxu0 %v586_v16  ;;  %v848_v16 = vld [vmem:[%s2445_s6 + $0x98] sm:$0xff] }
  0x63   : > { %749 = vmatpush2.msra.mxu0 %v585_v17  ;;  %v847_v17 = vld [vmem:[%s2445_s6 + $0x90] sm:$0xff] }
  0x64   : > { %750 = vmatprep.subr.mxu0 %v584_v18  ;;  %v846_v18 = vld [vmem:[%s2445_s6 + $0x88] sm:$0xff] }
  0x65   : > { %751 = vmatpush2.msra.mxu0 %v583_v19  ;;  %v845_v19 = vld [vmem:[%s2445_s6 + $0x80] sm:$0xff] }
  0xe6   : > { %v508_v27 = vpop.f32.mrf.mxu0 }
  0xe7   : > { %v1961_v30 = vadd.f32 %v508_v27, %v428_v26  ;;  %v839_v27 = vld [vmem:[%s2445_s6 + $0x50] sm:$0xff] }
  0xe8   : > { %v510_v29 = vpop.f32.mrf.mxu0 }
  0xe9   : > { %v1963_v31 = vadd.f32 %v510_v29, %v432_v28  ;;  %v533_v35 = vmul.f32 %v1961_v30, %v1961_v30  ;;  %v837_v29 = vld [vmem:[%s2445_s6 + $0x40] sm:$0xff] }
  0xea   : > { %v514_v32 = vpop.f32.mrf.mxu0 }
  0xeb   : > { %v1965_v33 = vadd.f32 %v514_v32, %v428_v26  ;;  %v534_v39 = vmul.f32 %v1963_v31, %v1963_v31  ;;  %v840_v26 = vld [vmem:[%s2445_s6 + $0x58] sm:$0xff] }
  0xec   : > { %v516_v34 = vpop.f32.mrf.mxu0  ;;  %v836_v32 = vld [vmem:[%s2445_s6 + $0x38] sm:$0xff] }
  0xed   : > { %v519_v36 = vadd.f32 %v1965_v33, %v1961_v30  ;;  %v535_v37 = vmul.f32 %v1965_v33, %v1965_v33  ;;  %v1973_v38 = vadd.f32 %v516_v34, %v432_v28  ;;  %v838_v28 = vld [vmem:[%s2445_s6 + $0x48] sm:$0xff]  ;;  %v835_v34 = vld [vmem:[%s2445_s6 + $0x30] sm:$0xff] }
  0xef   : > { %v520_v40 = vrot.slane %v519_v36, 4  ;;  %v537_v41 = vadd.f32 %v535_v37, %v533_v35  ;;  %v526_v42 = vadd.f32 %v1973_v38, %v1963_v31  ;;  %v536_v43 = vmul.f32 %v1973_v38, %v1973_v38  ;;  %v834_v35 = vld [vmem:[%s2445_s6 + $0x28] sm:$0xff]  ;;  %v832_v37 = vld [vmem:[%s2445_s6 + $0x18] sm:$0xff] }
  0xf1   : > { %v521_v44 = vadd.f32 %v520_v40, %v519_v36  ;;  %v538_v45 = vrot.slane %v537_v41, 4  ;;  %v544_v46 = vadd.f32 %v536_v43, %v534_v39  ;;  %v527_v47 = vrot.slane %v526_v42, 4  ;;  %v833_v36 = vld [vmem:[%s2445_s6 + $0x20] sm:$0xff]  ;;  %v831_v39 = vld [vmem:[%s2445_s6 + $0x10] sm:$0xff]  ;;  %v830_v40 = vld [vmem:[%s2445_s6 + $0x8] sm:$0xff] }
  0xf2   : > { %v891_v43 = vld [vmem:[%s2445_s6 + $0x1f0] sm:$0xff] }
  0xf3   : > { %v539_v48 = vadd.f32 %v538_v45, %v537_v41  ;;  %v545_v49 = vrot.slane %v544_v46, 4  ;;  %v528_v50 = vadd.f32 %v527_v47, %v526_v42  ;;  %v522_v51 = vrot.slane %v521_v44, 2  ;;  %v829_v41 = vld [vmem:[%s2445_s6] sm:$0xff]  ;;  %v892_v42 = vld [vmem:[%s2445_s6 + $0x1f8] sm:$0xff]  ;;  %v887_v47 = vld [vmem:[%s2445_s6 + $0x1d0] sm:$0xff] }
  0xf4   : > { %v889_v45 = vld [vmem:[%s2445_s6 + $0x1e0] sm:$0xff] }
  0xf5   : > { %v540_v52 = vrot.slane %v539_v48, 2  ;;  %v529_v53 = vrot.slane %v528_v50, 2  ;;  %v523_v54 = vadd.f32 %v522_v51, %v521_v44  ;;  %v546_v55 = vadd.f32 %v545_v49, %v544_v46  ;;  %v890_v44 = vld [vmem:[%s2445_s6 + $0x1e8] sm:$0xff]  ;;  %v888_v46 = vld [vmem:[%s2445_s6 + $0x1d8] sm:$0xff]  ;;  %v885_v49 = vld [vmem:[%s2445_s6 + $0x1c0] sm:$0xff] }
  0xf6   : > { %v883_v51 = vld [vmem:[%s2445_s6 + $0x1b0] sm:$0xff] }
  0xf7   : > { %v541_v56 = vadd.f32 %v540_v52, %v539_v48  ;;  %v530_v57 = vadd.f32 %v529_v53, %v528_v50  ;;  %v547_v58 = vrot.slane %v546_v55, 2  ;;  %v524_v59 = vrot.slane %v523_v54, 1  ;;  %v886_v48 = vld [vmem:[%s2445_s6 + $0x1c8] sm:$0xff]  ;;  %v884_v50 = vld [vmem:[%s2445_s6 + $0x1b8] sm:$0xff]  ;;  %v881_v53 = vld [vmem:[%s2445_s6 + $0x1a0] sm:$0xff] }
  0xf8   : > { %v882_v52 = vld [vmem:[%s2445_s6 + $0x1a8] sm:$0xff] }
  0xf9   : > { %v531_v60 = vrot.slane %v530_v57, 1  ;;  %v548_v61 = vadd.f32 %v547_v58, %v546_v55  ;;  %v542_v62 = vrot.slane %v541_v56, 1  ;;  %v525_v1 = vadd.f32 %v524_v59, %v523_v54  ;;  %v880_v54 = vld [vmem:[%s2445_s6 + $0x198] sm:$0xff]  ;;  %v879_v55 = vld [vmem:[%s2445_s6 + $0x190] sm:$0xff] }
  0xfa   : > { %v876_v58 = vld [vmem:[%s2445_s6 + $0x178] sm:$0xff]  ;;  %v875_v59 = vld [vmem:[%s2445_s6 + $0x170] sm:$0xff] }
  0xfb   : > { %v532_v63 = vadd.f32 %v531_v60, %v530_v57  ;;  %v549_v0 = vrot.slane %v548_v61, 1  ;;  %v543_v6 = vadd.f32 %v542_v62, %v541_v56  ;;  %v878_v56 = vld [vmem:[%s2445_s6 + $0x188] sm:$0xff]  ;;  %v877_v57 = vld [vmem:[%s2445_s6 + $0x180] sm:$0xff]  ;;  %v872_v62 = vld [vmem:[%s2445_s6 + $0x158] sm:$0xff] }
  0xfc   : > { %v874_v60 = vld [vmem:[%s2445_s6 + $0x168] sm:$0xff] }
  0xfd   : > { %679 = vmatprep.mubr.f32.mxu1 %v532_v63  ;;  %v550_v3 = vadd.f32 %v549_v0, %v548_v61  ;;  %v873_v61 = vld [vmem:[%s2445_s6 + $0x160] sm:$0xff]  ;;  %v871_v63 = vld [vmem:[%s2445_s6 + $0x150] sm:$0xff]  ;;  %v870_v0 = vld [vmem:[%s2445_s6 + $0x148] sm:$0xff] }
  0xfe   : > { %680 = vmatmul.mubr.f32.vlgmr.msra.gmra.mxu1 %v525_v1  ;;  %v869_v1 = vld [vmem:[%s2445_s6 + $0x140] sm:$0xff] }
  0xff   : > { %752 = vmatprep.mubr.f32.mxu0 %v550_v3  ;;  %906 = vmatpush1.msra.mxu1 %v859_v2  ;;  %v868_v2 = vld [vmem:[%s2445_s6 + $0x138] sm:$0xff]  ;;  %v867_v3 = vld [vmem:[%s2445_s6 + $0x130] sm:$0xff] }
 0x100   : > { %753 = vmatmul.mubr.f32.vlgmr.msra.gmra.mxu0 %v543_v6  ;;  %907 = vmatprep.subr.mxu1 %v858_v5  ;;  %v866_v5 = vld [vmem:[%s2445_s6 + $0x128] sm:$0xff]  ;;  %v865_v6 = vld [vmem:[%s2445_s6 + $0x120] sm:$0xff] }
 0x101   : > { %908 = vmatpush1.msra.mxu1 %v857_v7  ;;  %1079 = vmatprep.mubr.f32.mxu0 %v1585_v4  ;;  %v864_v7 = vld [vmem:[%s2445_s6 + $0x118] sm:$0xff] }
 0x102   : > { %909 = vmatprep.subr.mxu1 %v856_v8  ;;  %v863_v8 = vld [vmem:[%s2445_s6 + $0x110] sm:$0xff] }
 0x103   : > { %910 = vmatpush1.msra.mxu1 %v855_v9  ;;  %v862_v9 = vld [vmem:[%s2445_s6 + $0x108] sm:$0xff] }
 0x104   : > { %911 = vmatprep.subr.mxu1 %v854_v10  ;;  %v861_v10 = vld [vmem:[%s2445_s6 + $0x100] sm:$0xff] }
 0x105   : > { %912 = vmatpush1.msra.mxu1 %v853_v11 }
 0x106   : > { %913 = vmatprep.subr.mxu1 %v852_v12 }
 0x107   : > { %914 = vmatpush1.msra.mxu1 %v851_v13 }
 0x108   : > { %915 = vmatprep.subr.mxu1 %v850_v14 }
 0x109   : > { %916 = vmatpush1.msra.mxu1 %v849_v15 }
 0x10a   : > { %917 = vmatprep.subr.mxu1 %v848_v16 }
 0x10b   : > { %918 = vmatpush1.msra.mxu1 %v847_v17 }
 0x10c   : > { %919 = vmatprep.subr.mxu1 %v846_v18 }
 0x10d   : > { %920 = vmatpush1.msra.mxu1 %v845_v19 }
 0x10e   : > { %921 = vmatprep.subr.mxu1 %v844_v20 }
 0x10f   : > { %922 = vmatpush1.msra.mxu1 %v843_v21 }
 0x110   : > { %923 = vmatprep.subr.mxu1 %v842_v22 }
 0x111   : > { %924 = vmatpush1.msra.mxu1 %v841_v24 }
 0x112   : > { %925 = vmatprep.subr.mxu1 %v840_v26 }
 0x113   : > { %926 = vmatpush1.msra.mxu1 %v839_v27 }
 0x114   : > { %927 = vmatprep.subr.mxu1 %v838_v28  ;;  %v793_v28 = vld [vmem:[%s2442_s3] sm:$0x3] }
 0x115   : > { %928 = vmatpush1.msra.mxu1 %v837_v29 }
 0x116   : > { %929 = vmatprep.subr.mxu1 %v836_v32 }
 0x117   : > { %930 = vmatpush1.msra.mxu1 %v835_v34 }
 0x118   : > { %931 = vmatprep.subr.mxu1 %v834_v35  ;;  %v798_v35 = vrot.slane %v793_v28, %v1952_v23 }
 0x119   : > { %932 = vmatpush1.msra.mxu1 %v833_v36  ;;  %v809_v36 = vld [vmem:[%s2443_s4] sm:$0x3] }
 0x11a   : > { %933 = vmatprep.subr.mxu1 %v832_v37 }
 0x11b   : > { %934 = vmatpush1.msra.mxu1 %v831_v39 }
 0x11c   : > { %935 = vmatprep.subr.mxu1 %v830_v40 }
 0x11d   : > { %936 = vmatpush1.msra.mxu1 %v829_v41  ;;  %v802_v41 = vrot.slane %v793_v28, %v1957_v25  ;;  %v1183_v28 = vld [vmem:[%s2449_s10 + $0xb8] sm:$0xff] }
 0x11e   : > { %937 = vmatprep.subr.mxu1 %v892_v42 }
 0x11f   : > { %938 = vmatpush2.msra.mxu1 %v891_v43 }
 0x120   : > { %939 = vmatprep.subr.mxu1 %v890_v44 }
 0x121   : > { %940 = vmatpush2.msra.mxu1 %v889_v45  ;;  %v814_v45 = vrot.slane %v809_v36, %v1952_v23 }
 0x122   : > { %941 = vmatprep.subr.mxu1 %v888_v46 }
 0x123   : > { %942 = vmatpush2.msra.mxu1 %v887_v47 }
 0x124   : > { %943 = vmatprep.subr.mxu1 %v886_v48  ;;  %v818_v48 = vrot.slane %v809_v36, %v1957_v25  ;;  %v1181_v36 = vld [vmem:[%s2449_s10 + $0xa8] sm:$0xff] }
 0x125   : > { %944 = vmatpush2.msra.mxu1 %v885_v49 }
 0x126   : > { %945 = vmatprep.subr.mxu1 %v884_v50 }
 0x127   : > { %946 = vmatpush2.msra.mxu1 %v883_v51 }
 0x128   : > { %947 = vmatprep.subr.mxu1 %v882_v52 }
 0x129   : > { %948 = vmatpush2.msra.mxu1 %v881_v53 }
 0x12a   : > { %949 = vmatprep.subr.mxu1 %v880_v54 }
 0x12b   : > { %950 = vmatpush2.msra.mxu1 %v879_v55 }
 0x12c   : > { %951 = vmatprep.subr.mxu1 %v878_v56 }
 0x12d   : > { %952 = vmatpush2.msra.mxu1 %v877_v57 }
 0x12e   : > { %953 = vmatprep.subr.mxu1 %v876_v58 }
 0x12f   : > { %954 = vmatpush2.msra.mxu1 %v875_v59 }
 0x130   : > { %955 = vmatprep.subr.mxu1 %v874_v60 }
 0x131   : > { %956 = vmatpush2.msra.mxu1 %v873_v61  ;;  %v893_v61 = vld [vmem:[%s2446_s7] sm:$0x3] }
 0x132   : > { %957 = vmatprep.subr.mxu1 %v872_v62 }
 0x133   : > { %958 = vmatpush2.msra.mxu1 %v871_v63  ;;  %v902_v63 = vrot.slane %v893_v61, %v1957_v25  ;;  %v1175_v25 = vld [vmem:[%s2449_s10 + $0x78] sm:$0xff] }
 0x134   : > { %959 = vmatprep.subr.mxu1 %v870_v0  ;;  %v898_v0 = vrot.slane %v893_v61, %v1952_v23 }
 0x135   : > { %960 = vmatpush2.msra.mxu1 %v869_v1 }
 0x136   : > { %961 = vmatprep.subr.mxu1 %v868_v2 }
 0x137   : > { %962 = vmatpush2.msra.mxu1 %v867_v3 }
 0x138   : > { %963 = vmatprep.subr.mxu1 %v866_v5 }
 0x139   : > { %964 = vmatpush2.msra.mxu1 %v865_v6 }
 0x13a   : > { %965 = vmatprep.subr.mxu1 %v864_v7  ;;  %v982_v7 = vld [vmem:[%s2198_s30] sm:$0xff] }
 0x13b   : > { %966 = vmatpush2.msra.mxu1 %v863_v8  ;;  %v1190_v8 = vld [vmem:[%s2449_s10 + $0xf0] sm:$0xff] }
 0x13c   : > { %967 = vmatprep.subr.mxu1 %v862_v9  ;;  %v1174_v9 = vld [vmem:[%s2449_s10 + $0x70] sm:$0xff] }
 0x13d   : > { %968 = vmatpush2.msra.mxu1 %v861_v10  ;;  %v983_v10 = vld [vmem:[%s2198_s30 + $0x8] sm:$0xff] }
 0x1be   : > { %v681_v11 = vpop.f32.mrf.mxu1 }
 0x1bf   : > { %v686_v12 = vmul.f32 0.00390625, %v681_v11  ;;  %v1189_v11 = vld [vmem:[%s2449_s10 + $0xe8] sm:$0xff] }
 0x1c0   : > { %v683_v13 = vpop.f32.mrf.mxu1  ;;  %v754_v14 = vpop.f32.mrf.mxu0 }
 0x1c1   : > { %v761_v15 = vmul.f32 %v686_v12, %v686_v12  ;;  %v687_v16 = vmul.f32 0.00390625, %v683_v13  ;;  %v759_v17 = vmul.f32 0.00390625, %v754_v14  ;;  %v772_v27 = vrot.slane %v686_v12, %v1952_v23  ;;  %v1173_v12 = vld [vmem:[%s2449_s10 + $0x68] sm:$0xff]  ;;  %v1188_v13 = vld [vmem:[%s2449_s10 + $0xe0] sm:$0xff] }
 0x1c2   : > { %v756_v18 = vpop.f32.mrf.mxu0  ;;  %v1172_v14 = vld [vmem:[%s2449_s10 + $0x60] sm:$0xff] }
 0x1c3   : > { %v762_v19 = vmul.f32 %v687_v16, %v687_v16  ;;  %v763_v20 = vsub.f32 %v759_v17, %v761_v15  ;;  %v760_v21 = vmul.f32 0.00390625, %v756_v18  ;;  %v776_v29 = vrot.slane %v687_v16, %v1952_v23  ;;  %v984_v15 = vld [vmem:[%s2198_s30 + $0x10] sm:$0xff]  ;;  %v1187_v16 = vld [vmem:[%s2449_s10 + $0xd8] sm:$0xff] }
 0x1c4   : > { %v777_v34 = vsub.f32 %v1961_v30, %v772_v27  ;;  %v779_v40 = vsub.f32 %v1965_v33, %v772_v27  ;;  %v1171_v17 = vld [vmem:[%s2449_s10 + $0x58] sm:$0xff]  ;;  %v1186_v18 = vld [vmem:[%s2449_s10 + $0xd0] sm:$0xff]  ;;  %v986_v27 = vld [vmem:[%s2198_s30 + $0x20] sm:$0xff] }
 0x1c5   : > { %v765_v22 = vadd.f32 1e-05, %v763_v20  ;;  %v764_v24 = vsub.f32 %v760_v21, %v762_v19  ;;  %v778_v42 = vsub.f32 %v1963_v31, %v776_v29  ;;  %v780_v43 = vsub.f32 %v1973_v38, %v776_v29  ;;  %v1170_v19 = vld [vmem:[%s2449_s10 + $0x50] sm:$0xff]  ;;  %v985_v20 = vld [vmem:[%s2198_s30 + $0x18] sm:$0xff]  ;;  %v1185_v21 = vld [vmem:[%s2449_s10 + $0xc8] sm:$0xff] }
 0x1c6   : > { %v1167_v29 = vld [vmem:[%s2449_s10 + $0x38] sm:$0xff] }
 0x1c7   : > { %1519 = vrsqrt.f32 %v765_v22  ;;  %v766_v26 = vadd.f32 1e-05, %v764_v24  ;;  %v1169_v22 = vld [vmem:[%s2449_s10 + $0x48] sm:$0xff]  ;;  %v1184_v24 = vld [vmem:[%s2449_s10 + $0xc0] sm:$0xff] }
 0x1c9   : > { %1521 = vrsqrt.f32 %v766_v26  ;;  %v1168_v26 = vld [vmem:[%s2449_s10 + $0x40] sm:$0xff] }
 0x1d4   : > { %v1520_v32 = vpop.eup %1519 }
 0x1d5   : > { %v784_v37 = vrot.slane %v1520_v32, %v1952_v23  ;;  %v1182_v32 = vld [vmem:[%s2449_s10 + $0xb0] sm:$0xff] }
 0x1d6   : > { %v1522_v39 = vpop.eup %1521 }
 0x1d7   : > { %v788_v44 = vrot.slane %v1522_v39, %v1952_v23  ;;  %v789_v30 = vmul.f32 %v784_v37, %v777_v34  ;;  %v791_v46 = vmul.f32 %v784_v37, %v779_v40  ;;  %v1191_v23 = vld [vmem:[%s2449_s10 + $0xf8] sm:$0xff]  ;;  %v1166_v34 = vld [vmem:[%s2449_s10 + $0x30] sm:$0xff]  ;;  %v1165_v37 = vld [vmem:[%s2449_s10 + $0x28] sm:$0xff] }
 0x1d8   : > { %v1180_v39 = vld [vmem:[%s2449_s10 + $0xa0] sm:$0xff] }
 0x1d9   : > { %v790_v47 = vmul.f32 %v788_v44, %v778_v42  ;;  %v805_v49 = vmul.f32 %v798_v35, %v789_v30  ;;  %v792_v50 = vmul.f32 %v788_v44, %v780_v43  ;;  %v807_v53 = vmul.f32 %v798_v35, %v791_v46  ;;  %v987_v35 = vld [vmem:[%s2198_s30 + $0x28] sm:$0xff]  ;;  %v1164_v40 = vld [vmem:[%s2449_s10 + $0x20] sm:$0xff]  ;;  %v1179_v42 = vld [vmem:[%s2449_s10 + $0x98] sm:$0xff] }
 0x1da   : > { %v1163_v43 = vld [vmem:[%s2449_s10 + $0x18] sm:$0xff]  ;;  %v1178_v30 = vld [vmem:[%s2449_s10 + $0x90] sm:$0xff]  ;;  %v1177_v46 = vld [vmem:[%s2449_s10 + $0x88] sm:$0xff] }
 0x1db   : > { %v806_v51 = vmul.f32 %v802_v41, %v790_v47  ;;  %v808_v52 = vmul.f32 %v802_v41, %v792_v50  ;;  %v821_v33 = vadd.f32 %v814_v45, %v805_v49  ;;  %v823_v56 = vadd.f32 %v814_v45, %v807_v53  ;;  %v988_v41 = vld [vmem:[%s2198_s30 + $0x30] sm:$0xff]  ;;  %v989_v44 = vld [vmem:[%s2198_s30 + $0x38] sm:$0xff]  ;;  %v1176_v47 = vld [vmem:[%s2449_s10 + $0x80] sm:$0xff]  ;;  %s2370_s30 = scalar_lea.vmem [#allocation2], %s1398_s25 }
 0x1dc   : > { %v1162_v45 = vld [vmem:[%s2449_s10 + $0x10] sm:$0xff]  ;;  %v1129_v50 = vld [vmem:[%s2448_s9 + $0x8] sm:$0xff]  ;;  %s1320_s14 = sshll.u32 %s2370_s30, 4  ;;  %s2393_s14 = int_to_ptr.vmem [resolvable:$true] %s1320_s14 }
 0x1dd   : > { %v822_v54 = vadd.f32 %v818_v48, %v806_v51  ;;  %v824_v31 = vadd.f32 %v818_v48, %v808_v52  ;;  %v825_v38 = vmax.f32 %v821_v33, 0.0  ;;  %v827_v58 = vmax.f32 %v823_v56, 0.0  ;;  %v1160_v48 = vld [vmem:[%s2449_s10] sm:$0xff]  ;;  %s1523_s26 = scalar_lea.vmem %s2393_s14, 1024  ;;  %p1530_p0 = scmp.lt.s32.totalorder %s2393_s14, %s1528_s15 }
 0x1de   : > { %v1128_v51 = vld [vmem:[%s2448_s9] sm:$0xff]  ;;  %p1524_p11 = scmp.ne.s32.totalorder %s2393_s14, %s1523_s26  ;;  %p1531_p1 = scmp.lt.s32.totalorder %s1529_s23, %s1523_s26 }
 0x1df   : > { %v826_v55 = vmax.f32 %v822_v54, 0.0  ;;  %v828_v57 = vmax.f32 %v824_v31, 0.0  ;;  %v1131_v31 = vld [vmem:[%s2448_s9 + $0x18] sm:$0xff] }
 0x1e0   : > { %p1525_p12 = pnand %p1524_p11, %p1687_p5  ;;  %p1532_p2 = por %p1531_p1, %p1530_p0 }
 0x1e1   : > { %969 = vmatprep.mubr.f32.mxu1 %v826_v55  ;;  %v1130_v55 = vld [vmem:[%s2448_s9 + $0x10] sm:$0xff] }
 0x1e2   : > { %970 = vmatmul.mubr.f32.vlgmr.msra.gmra.mxu1 %v825_v38  ;;  %p1526_p13 = pneg %p1525_p12 }
 0x1e3   : > { %975 = vmatprep.mubr.f32.mxu1 %v828_v57 }
 0x1e4   : > { %p1533_p3 = pnand %p1532_p2, %p1526_p13 }
 0x1e6   : > { %976 = vmatmul.mubr.f32.gmra.mxu1 %v827_v58 }
 0x2a2   : > { %v971_v59 = vpop.f32.mrf.mxu1 }
 0x2a3   : > { %v972_v6 = vadd.f32 %v971_v59, %v898_v0  ;;  %v1133_v59 = vld [vmem:[%s2448_s9 + $0x28] sm:$0xff] }
 0x2a4   : > { %v973_v60 = vpop.f32.mrf.mxu1 }
 0x2a5   : > { %v974_v5 = vadd.f32 %v973_v60, %v902_v63  ;;  %v1132_v60 = vld [vmem:[%s2448_s9 + $0x20] sm:$0xff] }
 0x2a6   : > { %v977_v62 = vpop.f32.mrf.mxu1 }
 0x2a7   : > { %v978_v3 = vadd.f32 %v977_v62, %v898_v0 }
 0x2a8   : > { %v979_v1 = vpop.f32.mrf.mxu1 }
 0x2a9   : > { %v980_v2 = vadd.f32 %v979_v1, %v902_v63  ;;  %v1135_v1 = vld [vmem:[%s2448_s9 + $0x38] sm:$0xff] }
 0x2ab   : > { %1043 = vmatprep.subr.mxu0 %v980_v2  ;;  %v1134_v2 = vld [vmem:[%s2448_s9 + $0x30] sm:$0xff] }
 0x2ac   : > { %1044 = vmatpush1.msra.mxu0 %v978_v3 }
 0x2ad   : > { %1045 = vmatprep.subr.mxu0 %v974_v5 }
 0x2ae   : > { %1046 = vmatpush1.msra.mxu0 %v972_v6 }
 0x2af   : > { %1405 = vmatmul.mubr.msk.f32.vlgmr.msra.gmra.mxu0 %vm990_vm1, %v982_v7  ;;  %1421 = vmatprep.subr.mxu0 %v1191_v23  ;;  %v1137_v23 = vld [vmem:[%s2448_s9 + $0x48] sm:$0xff] }
 0x2b0   : > { %1085 = vmatprep.mubr.f32.mxu0 %v1585_v4  ;;  %1422 = vmatpush3.msra.mxu0 %v1175_v25  ;;  %v1136_v25 = vld [vmem:[%s2448_s9 + $0x40] sm:$0xff] }
 0x2b1   : > { %1423 = vmatprep.subr.mxu0 %v1190_v8 }
 0x2b2   : > { %1424 = vmatpush3.msra.mxu0 %v1174_v9 }
 0x2b3   : > { %1406 = vmatmul.mubr.msk.f32.gmra.mxu0 %vm990_vm1, %v983_v10  ;;  %1425 = vmatprep.subr.mxu0 %v1189_v11 }
 0x2b4   : > { %1091 = vmatprep.mubr.f32.mxu0 %v1585_v4  ;;  %1426 = vmatpush3.msra.mxu0 %v1173_v12  ;;  %v1139_v12 = vld [vmem:[%s2448_s9 + $0x58] sm:$0xff] }
 0x2b5   : > { %1427 = vmatprep.subr.mxu0 %v1188_v13  ;;  %v1138_v13 = vld [vmem:[%s2448_s9 + $0x50] sm:$0xff] }
 0x2b6   : > { %1428 = vmatpush3.msra.mxu0 %v1172_v14 }
 0x2b7   : > { %1407 = vmatmul.mubr.msk.f32.gmra.mxu0 %vm990_vm1, %v984_v15  ;;  %1429 = vmatprep.subr.mxu0 %v1187_v16 }
 0x2b8   : > { %1097 = vmatprep.mubr.f32.mxu0 %v1585_v4  ;;  %1430 = vmatpush3.msra.mxu0 %v1171_v17 }
 0x2b9   : > { %1431 = vmatprep.subr.mxu0 %v1186_v18  ;;  %v1141_v18 = vld [vmem:[%s2448_s9 + $0x68] sm:$0xff] }
 0x2ba   : > { %1432 = vmatpush3.msra.mxu0 %v1170_v19  ;;  %v1140_v19 = vld [vmem:[%s2448_s9 + $0x60] sm:$0xff] }
 0x2bb   : > { %1408 = vmatmul.mubr.msk.f32.gmra.mxu0 %vm990_vm1, %v985_v20  ;;  %1433 = vmatprep.subr.mxu0 %v1185_v21 }
 0x2bc   : > { %1103 = vmatprep.mubr.f32.mxu0 %v1585_v4  ;;  %1434 = vmatpush3.msra.mxu0 %v1169_v22 }
 0x2bd   : > { %1435 = vmatprep.subr.mxu0 %v1184_v24 }
 0x2be   : > { %1436 = vmatpush3.msra.mxu0 %v1168_v26  ;;  %v1143_v26 = vld [vmem:[%s2448_s9 + $0x78] sm:$0xff] }
 0x2bf   : > { %1409 = vmatmul.mubr.msk.f32.gmra.mxu0 %vm990_vm1, %v986_v27  ;;  %1437 = vmatprep.subr.mxu0 %v1183_v28  ;;  %v1142_v27 = vld [vmem:[%s2448_s9 + $0x70] sm:$0xff] }
 0x2c0   : > { %1109 = vmatprep.mubr.f32.mxu0 %v1585_v4  ;;  %1438 = vmatpush3.msra.mxu0 %v1167_v29 }
 0x2c1   : > { %1439 = vmatprep.subr.mxu0 %v1182_v32 }
 0x2c2   : > { %1440 = vmatpush3.msra.mxu0 %v1166_v34 }
 0x2c3   : > { %1410 = vmatmul.mubr.msk.f32.gmra.mxu0 %vm990_vm1, %v987_v35  ;;  %1441 = vmatprep.subr.mxu0 %v1181_v36 }
 0x2c4   : > { %1115 = vmatprep.mubr.f32.mxu0 %v1585_v4  ;;  %1442 = vmatpush3.msra.mxu0 %v1165_v37 }
 0x2c5   : > { %1443 = vmatprep.subr.mxu0 %v1180_v39 }
 0x2c6   : > { %1444 = vmatpush3.msra.mxu0 %v1164_v40 }
 0x2c7   : > { %1411 = vmatmul.mubr.msk.f32.gmra.mxu0 %vm990_vm1, %v988_v41  ;;  %1445 = vmatprep.subr.mxu0 %v1179_v42 }
 0x2c8   : > { %1121 = vmatprep.mubr.f32.mxu0 %v1585_v4  ;;  %1446 = vmatpush3.msra.mxu0 %v1163_v43  ;;  %v1161_v4 = vld [vmem:[%s2449_s10 + $0x8] sm:$0xff] }
 0x2c9   : > { %1447 = vmatprep.subr.mxu0 %v1178_v30 }
 0x2ca   : > { %1448 = vmatpush3.msra.mxu0 %v1162_v45 }
 0x2cb   : > { %1412 = vmatmul.mubr.msk.f32.gmra.mxu0 %vm990_vm1, %v989_v44  ;;  %1449 = vmatprep.subr.mxu0 %v1177_v46 }
 0x2cc   : > { %1450 = vmatpush3.msra.mxu0 %v1161_v4 }
 0x2cd   : > { %1451 = vmatprep.subr.mxu0 %v1176_v47 }
 0x2ce   : > { %1452 = vmatpush3.msra.mxu0 %v1160_v48 }
 0x36f   : > { %v1081_v49 = vpop.f32.mrf.mxu0 }
 0x370   : > { %v1144_v53 = vmul.f32 %v1128_v51, %v1081_v49 }
 0x371   : > { %v1083_v52 = vpop.f32.mrf.mxu0 }
 0x372   : > { %v1145_v33 = vmul.f32 %v1129_v50, %v1083_v52 }
 0x373   : > { %v1087_v54 = vpop.f32.mrf.mxu0 }
 0x374   : > { %1256 = vmatprep.mubr.f32.mxu0 %v1145_v33  ;;  %v1146_v57 = vmul.f32 %v1130_v55, %v1087_v54 }
 0x375   : > { %v1089_v38 = vpop.f32.mrf.mxu0  ;;  %1257 = vmatmul.mubr.f32.vlgmr.msra.gmra.mxu0 %v1144_v53 }
 0x376   : > { %v1147_v56 = vmul.f32 %v1131_v31, %v1089_v38 }
 0x377   : > { %v1093_v58 = vpop.f32.mrf.mxu0 }
 0x378   : > { %1261 = vmatprep.mubr.f32.mxu0 %v1147_v56  ;;  %v1148_v63 = vmul.f32 %v1132_v60, %v1093_v58 }
 0x379   : > { %v1095_v61 = vpop.f32.mrf.mxu0  ;;  %1262 = vmatmul.mubr.f32.gmra.mxu0 %v1146_v57 }
 0x37a   : > { %v1149_v62 = vmul.f32 %v1133_v59, %v1095_v61 }
 0x37b   : > { %v1099_v0 = vpop.f32.mrf.mxu0 }
 0x37c   : > { %1266 = vmatprep.mubr.f32.mxu0 %v1149_v62  ;;  %v1150_v6 = vmul.f32 %v1134_v2, %v1099_v0 }
 0x37d   : > { %v1101_v3 = vpop.f32.mrf.mxu0  ;;  %1267 = vmatmul.mubr.f32.gmra.mxu0 %v1148_v63 }
 0x37e   : > { %v1151_v5 = vmul.f32 %v1135_v1, %v1101_v3 }
 0x37f   : > { %v1105_v7 = vpop.f32.mrf.mxu0 }
 0x380   : > { %1271 = vmatprep.mubr.f32.mxu0 %v1151_v5  ;;  %v1152_v10 = vmul.f32 %v1136_v25, %v1105_v7 }
 0x381   : > { %v1107_v8 = vpop.f32.mrf.mxu0  ;;  %1272 = vmatmul.mubr.f32.gmra.mxu0 %v1150_v6 }
 0x382   : > { %v1153_v9 = vmul.f32 %v1137_v23, %v1107_v8 }
 0x383   : > { %v1111_v11 = vpop.f32.mrf.mxu0 }
 0x384   : > { %1276 = vmatprep.mubr.f32.mxu0 %v1153_v9  ;;  %v1154_v16 = vmul.f32 %v1138_v13, %v1111_v11 }
 0x385   : > { %v1113_v14 = vpop.f32.mrf.mxu0  ;;  %1277 = vmatmul.mubr.f32.gmra.mxu0 %v1152_v10 }
 0x386   : > { %v1155_v15 = vmul.f32 %v1139_v12, %v1113_v14 }
 0x387   : > { %v1117_v17 = vpop.f32.mrf.mxu0 }
 0x388   : > { %1281 = vmatprep.mubr.f32.mxu0 %v1155_v15  ;;  %v1156_v22 = vmul.f32 %v1140_v19, %v1117_v17 }
 0x389   : > { %v1119_v20 = vpop.f32.mrf.mxu0  ;;  %1282 = vmatmul.mubr.f32.gmra.mxu0 %v1154_v16 }
 0x38a   : > { %v1157_v21 = vmul.f32 %v1141_v18, %v1119_v20 }
 0x38b   : > { %v1123_v24 = vpop.f32.mrf.mxu0 }
 0x38c   : > { %1286 = vmatprep.mubr.f32.mxu0 %v1157_v21  ;;  %v1158_v32 = vmul.f32 %v1142_v27, %v1123_v24 }
 0x38d   : > { %v1125_v28 = vpop.f32.mrf.mxu0  ;;  %1287 = vmatmul.mubr.f32.gmra.mxu0 %v1156_v22 }
 0x38e   : > { %v1159_v29 = vmul.f32 %v1143_v26, %v1125_v28 }
 0x390   : > { %1291 = vmatprep.mubr.f32.mxu0 %v1159_v29 }
 0x391   : > { %1292 = vmatmul.mubr.f32.gmra.mxu0 %v1158_v32 }
 0x435   : > { %v1453_v34 = vpop.f32.mrf.mxu0 }
 0x437   : > { %v1454_v35 = vpop.f32.mrf.mxu0 }
 0x438   : > { %v1455_v36 = vadd.f32 %v1454_v35, %v1453_v34 }
 0x439   : > { %v1456_v37 = vpop.f32.mrf.mxu0 }
 0x43a   : > { %1298 = vst.msk [vmem:[%s2370_s30] sm:$0xff] %vm1297_vm2, %v1455_v36 }
 0x43b   : > { %v1457_v39 = vpop.f32.mrf.mxu0 }
 0x43c   : > { %v1458_v40 = vadd.f32 %v1457_v39, %v1456_v37 }
 0x43d   : > { %v1459_v41 = vpop.f32.mrf.mxu0 }
 0x43e   : > { %1299 = vst.msk [vmem:[%s2370_s30 + $0x8] sm:$0xff] %vm1297_vm2, %v1458_v40 }
 0x43f   : > { %v1460_v42 = vpop.f32.mrf.mxu0 }
 0x440   : > { %v1461_v43 = vadd.f32 %v1460_v42, %v1459_v41 }
 0x441   : > { %v1462_v44 = vpop.f32.mrf.mxu0 }
 0x442   : > { %1300 = vst.msk [vmem:[%s2370_s30 + $0x10] sm:$0xff] %vm1297_vm2, %v1461_v43 }
 0x443   : > { %v1463_v30 = vpop.f32.mrf.mxu0 }
 0x444   : > { %v1464_v45 = vadd.f32 %v1463_v30, %v1462_v44 }
 0x445   : > { %v1465_v46 = vpop.f32.mrf.mxu0 }
 0x446   : > { %1301 = vst.msk [vmem:[%s2370_s30 + $0x18] sm:$0xff] %vm1297_vm2, %v1464_v45 }
 0x447   : > { %v1466_v4 = vpop.f32.mrf.mxu0 }
 0x448   : > { %v1467_v47 = vadd.f32 %v1466_v4, %v1465_v46 }
 0x449   : > { %v1468_v48 = vpop.f32.mrf.mxu0 }
 0x44a   : > { %1302 = vst.msk [vmem:[%s2370_s30 + $0x20] sm:$0xff] %vm1297_vm2, %v1467_v47 }
 0x44b   : > { %v1469_v49 = vpop.f32.mrf.mxu0 }
 0x44c   : > { %v1470_v50 = vadd.f32 %v1469_v49, %v1468_v48 }
 0x44d   : > { %v1471_v51 = vpop.f32.mrf.mxu0 }
 0x44e   : > { %1303 = vst.msk [vmem:[%s2370_s30 + $0x28] sm:$0xff] %vm1297_vm2, %v1470_v50 }
 0x44f   : > { %v1472_v52 = vpop.f32.mrf.mxu0 }
 0x450   : > { %v1473_v33 = vadd.f32 %v1472_v52, %v1471_v51 }
 0x451   : > { %v1474_v53 = vpop.f32.mrf.mxu0 }
 0x452   : > { %1304 = vst.msk [vmem:[%s2370_s30 + $0x30] sm:$0xff] %vm1297_vm2, %v1473_v33 }
 0x453   : > { %v1475_v54 = vpop.f32.mrf.mxu0 }
 0x454   : > { %v1476_v31 = vadd.f32 %v1475_v54, %v1474_v53 }
 0x456   : > { %1305 = vst.msk [vmem:[%s2370_s30 + $0x38] sm:$0xff] %vm1297_vm2, %v1476_v31 }
 0x457   : > { %1536 = shalt.err (!%p1533_p3)
}
 0x458   : > { %s1537_s16 = scalar_lea.hbm %s2391_s13, 1024  ;;  %s1541_s30 = scalar_lea.hbm %s2450_s11, 2048 }
 0x459   : > { %p1538_p4 = scmp.ne.s32.totalorder %s2391_s13, %s1537_s16  ;;  %p1542_p9 = scmp.lt.s32.totalorder %s2391_s13, %s2450_s11 }
 0x45a   : > { %p1543_p10 = scmp.lt.s32.totalorder %s1541_s30, %s1537_s16 }
 0x45b   : > { %p1539_p7 = pnand %p1538_p4, %p1687_p5 }
 0x45c   : > { %p1544_p11 = por %p1543_p10, %p1542_p9 }
 0x45d   : > { %p1540_p8 = pneg %p1539_p7 }
 0x45f   : > { %p1545_p12 = pnand %p1544_p11, %p1540_p8 }
 0x461   : > { %1548 = shalt.err (!%p1545_p12)
}
 0x462   : > { %s1587_s19 = smov 128   ;;  %s1588_s26 = smov 8  }
 0x463   : > { %1477 = dma.vmem_to_hbm [thread:$0]  (%p1687_p5), %s2393_s14, 1024, %s2391_s13, %s2399_s21, %s1587_s19, %s1587_s19, %s1588_s26  }
 0x464 PF: > { %p1483_p13 = scmp.ge.s32.totalorder %s1583_s20, 2  ;;  %s1335_s22 = sand.u32 1, %s1571_s17  }
 0x465   : > { %s1336_s15 = scalar_lea.sflag [#allocation3], %s1335_s22 }
 0x466   : > { %p1480_p0 = pnand %p1483_p13, %p1691_p6 }
 0x468   : > { %p1481_p1 = pneg %p1480_p0 }
 0x46a   : > { %1566 = dma.done.wait (%p1481_p1), %s1336_s15, 1024  }
 0x46b   : > { %1568 = vsyncadd (%p1481_p1), %s1336_s15, 4294966272  ;;  %s2459_s20 = sld [smem:[#allocation6_spill]]  ;;  %s2462_s17 = smov %s1575_s18 }
 0x46c   : > { %s2460_s23 = sld [smem:[#allocation5_spill]] }
 0x46d   : > { %s2461_s19 = sld [smem:[#allocation7_spill]] }
 0x471   : > { %p21_p2 = scmp.ge.s32.totalorder %s2459_s20, 4  }
 0x472   : > { %s2463_s18 = smov %s2460_s23 }
 0x473   :  { %23 = sbr.rel (!%p21_p2) target bundleno = 3 (0x3), region = 102 }
 0x478   :  { %1341 = vsyncpa [#allocation3], 1 }
 0x479   :  { %1343 = vsyncpa [#allocation3 + $0x1], 1 }

</bundles_post_ra>
